<compile_context>
chip_gen: v5e
topology: v5e:2x2
jax: 0.10.0
libtpu: 0.0.40
codegen_flags: <defaults>
</compile_context>

<pallas_src>
import math

import jax
import jax.numpy as jnp
from jax.experimental import pallas as pl
from jax.experimental.pallas import tpu as pltpu

# ----------------------------- model config --------------------------------
B, C, H, W = 2, 3, 16, 16              # small analog of [B, 3, 224, 224]
PATCH = 8
NPATCH = (H // PATCH) * (W // PATCH)   # 4 patches
SEQ = NPATCH + 1                       # CLS + patches = 5
DIM = 32                               # small analog of 768
NUM_HEADS = 4
HEAD_DIM = DIM // NUM_HEADS
MLP_DIM = 4 * DIM
NUM_LAYERS = 2
LN_EPS = 1e-12
CPP = C * PATCH * PATCH                # flattened patch length

# batch blocking: 1 => whole batch in one block.  Keep BATCH_BLOCKS <= #TensorCores
# (grow BB instead) so the layer-weight stream is not re-fetched per batch block.
BATCH_BLOCKS = 1
assert B % BATCH_BLOCKS == 0
BB = B // BATCH_BLOCKS                 # batch elements per block
N_TOK = BB * SEQ                       # flat token rows per block

N_CONST = 4 + SEQ                      # [patch_bias, cls, final_ln_g, final_ln_b, pos...]
N_SMALL = 8                            # packed per-layer small tensors (rows)

# preprocessing stats (forward denormalizes with ImageNet stats, then the FLAVA
# processor re-normalizes with CLIP-style stats)
IMAGENET_MEAN = jnp.array([0.485, 0.456, 0.406], jnp.float32)
IMAGENET_STD = jnp.array([0.229, 0.224, 0.225], jnp.float32)
FLAVA_MEAN = jnp.array([0.48145466, 0.4578275, 0.40821073], jnp.float32)
FLAVA_STD = jnp.array([0.26862954, 0.26130258, 0.27577711], jnp.float32)


# ------------------------------ small helpers -------------------------------
def _layer_norm(x, g, b):
    mu = jnp.mean(x, axis=-1, keepdims=True)
    var = jnp.mean((x - mu) ** 2, axis=-1, keepdims=True)
    return (x - mu) * jax.lax.rsqrt(var + LN_EPS) * g + b


def _erf(x):
    # Abramowitz & Stegun 7.1.26 (|err| <= 1.5e-7): exact-GELU quality using only
    # exp / reciprocal (EUP) + VPU arithmetic.
    a1, a2, a3, a4, a5 = 0.254829592, -0.284496736, 1.421413741, -1.453152027, 1.061405429
    p = 0.3275911
    sgn = jnp.where(x >= 0.0, 1.0, -1.0)
    ax = jnp.abs(x)
    t = pl.reciprocal(1.0 + p * ax, approx=False)
    poly = ((((a5 * t + a4) * t + a3) * t + a2) * t + a1) * t
    return sgn * (1.0 - poly * jnp.exp(-ax * ax))


def _gelu_exact(x):
    # HF FLAVA uses exact (erf) GELU.
    return 0.5 * x * (1.0 + _erf(x * 0.7071067811865476))


# ------------------------------- fused kernel -------------------------------
def _flava_kernel(patches_ref, pw_ref, consts_ref, wqkv_ref, wo_ref,
                  w1_ref, w2_ref, small_ref, o_ref, xs_ref, ctx_ref):
    l = pl.program_id(1)                     # layer index (inner, "arbitrary" axis)

    consts = consts_ref[...]                 # (N_CONST, DIM) f32
    pb = consts[0:1, :]                      # folded patch-embed bias
    cls_tok = consts[1:2, :]
    fg = consts[2:3, :]                      # final LN gamma / beta
    fb = consts[3:4, :]
    pos_cls = consts[4:5, :]
    pos_patch = consts[5:5 + NPATCH, :]      # (NPATCH, DIM)

    # ---- layer-0 prologue: patch embedding (+CLS, +pos) into the flat resident
    #      activation scratch.  Pixel re-normalization already folded into pw/pb. ----
    @pl.when(l == 0)
    def _embed():
        emb = jnp.dot(patches_ref[...], pw_ref[...],
                      preferred_element_type=jnp.float32) + pb     # (BB*NPATCH, DIM)
        cls_row = cls_tok + pos_cls                                # (1, DIM)
        for b in range(BB):
            xs_ref[pl.ds(b * SEQ, 1), :] = cls_row
            xs_ref[pl.ds(b * SEQ + 1, NPATCH), :] = (
                emb[b * NPATCH:(b + 1) * NPATCH, :] + pos_patch)

    # packed per-layer small tensors: one (N_SMALL, MLP_DIM) f32 block
    small = small_ref[0]
    ln1_g = small[0:1, 0:DIM]
    ln1_b = small[1:2, 0:DIM]
    b_qkv = small[2:3, 0:3 * DIM]
    b_o = small[3:4, 0:DIM]
    ln2_g = small[4:5, 0:DIM]
    ln2_b = small[5:6, 0:DIM]
    b1 = small[6:7, :]
    b2 = small[7:8, 0:DIM]

    x = xs_ref[...]                          # (N_TOK, DIM) f32

    # ---- pre-LN multi-head self-attention ----
    h = _layer_norm(x, ln1_g, ln1_b)
    qkv = jnp.dot(h.astype(jnp.bfloat16), wqkv_ref[0],
                  preferred_element_type=jnp.float32) + b_qkv      # (N_TOK, 3*DIM)

    def heads(base):
        # (N_TOK, 3*DIM) -> (BB*NUM_HEADS, SEQ, HEAD_DIM) via static slices stacked
        # along a new leading (batch*head) axis.
        parts = [qkv[b * SEQ:(b + 1) * SEQ,
                     base + hh * HEAD_DIM: base + (hh + 1) * HEAD_DIM]
                 for b in range(BB) for hh in range(NUM_HEADS)]
        return jnp.stack(parts, axis=0)

    qh = heads(0)
    kh = heads(DIM)
    vh = heads(2 * DIM)

    s = jnp.einsum("gqe,gke->gqk", qh, kh,
                   preferred_element_type=jnp.float32) * (1.0 / math.sqrt(HEAD_DIM))
    s = s - jnp.max(s, axis=-1, keepdims=True)
    p = jnp.exp(s)
    p = p * pl.reciprocal(jnp.sum(p, axis=-1, keepdims=True), approx=True)
    ctx = jnp.einsum("gqk,gke->gqe", p, vh,
                     preferred_element_type=jnp.float32)           # (G, SEQ, HEAD_DIM)

    # merge heads back to the flat (N_TOK, DIM) layout through a small VMEM scratch,
    # then a single (DIM, DIM) output projection.
    for b in range(BB):
        for hh in range(NUM_HEADS):
            ctx_ref[pl.ds(b * SEQ, SEQ), pl.ds(hh * HEAD_DIM, HEAD_DIM)] = (
                ctx[b * NUM_HEADS + hh])
    attn = jnp.dot(ctx_ref[...].astype(jnp.bfloat16), wo_ref[0],
                   preferred_element_type=jnp.float32) + b_o       # (N_TOK, DIM)
    x = x + attn

    # ---- pre-LN MLP ----
    h2 = _layer_norm(x, ln2_g, ln2_b)
    m = jnp.dot(h2.astype(jnp.bfloat16), w1_ref[0],
                preferred_element_type=jnp.float32) + b1           # (N_TOK, MLP_DIM)
    m = _gelu_exact(m)
    y = jnp.dot(m.astype(jnp.bfloat16), w2_ref[0],
                preferred_element_type=jnp.float32) + b2           # (N_TOK, DIM)
    x = x + y

    xs_ref[...] = x

    # ---- final LayerNorm of the CLS tokens, emitted only after the last layer ----
    @pl.when(l == pl.num_programs(1) - 1)
    def _final():
        for b in range(BB):
            o_ref[pl.ds(b, 1), :] = _layer_norm(x[b * SEQ:b * SEQ + 1, :], fg, fb)


# --------------------------- pallas_call wrapper -----------------------------
def flava_image_encoder(images, params):
    """images: float32 [B, 3, H, W] (ImageNet-normalized, NCHW) -> [B, DIM]."""
    # 1) fold the pixel re-normalization into the patch-embedding matmul:
    #    (x*scale + shift) @ W + b  ==  x @ (scale ⊙ W) + (shift @ W + b)
    scale = IMAGENET_STD / FLAVA_STD                       # (C,)
    shift = (IMAGENET_MEAN - FLAVA_MEAN) / FLAVA_STD       # (C,)
    scale_rows = jnp.repeat(scale, PATCH * PATCH)          # matches (c,ph,pw) im2row order
    shift_rows = jnp.repeat(shift, PATCH * PATCH)
    pw = params["patch_w"] * scale_rows[:, None]           # (CPP, DIM) f32
    pb = params["patch_b"].reshape(1, DIM) + shift_rows[None, :] @ params["patch_w"]
    # TODO(synk): FlavaProcessor's PIL resize-to-224 and uint8 round-trip are skipped;
    # input is assumed to already be at the model resolution.

    # 2) im2row: stride-PATCH conv == per-patch flatten + matmul (layout-only glue),
    #    presented flat so the kernel's patch embed is one 2-D matmul.
    hp, wp = H // PATCH, W // PATCH
    patches = (
        images.astype(jnp.float32)
        .reshape(B, C, hp, PATCH, wp, PATCH)
        .transpose(0, 2, 4, 1, 3, 5)                       # (B, hp, wp, C, ph, pw)
        .reshape(B * NPATCH, CPP)
    )

    # 3) pack model-level constants into one (N_CONST, DIM) array
    consts = jnp.concatenate([
        pb.reshape(1, DIM),
        params["cls"].reshape(1, DIM),
        params["final_ln_g"].reshape(1, DIM),
        params["final_ln_b"].reshape(1, DIM),
        params["pos"].reshape(SEQ, DIM),
    ], axis=0).astype(jnp.float32)

    # 4) pack the tiny per-layer tensors into one (L, N_SMALL, MLP_DIM) f32 array
    lw = params["layers"]

    def row(v):  # (L, K) -> (L, 1, MLP_DIM), zero-padded on lanes
        return jnp.pad(v, ((0, 0), (0, MLP_DIM - v.shape[-1])))[:, None, :]

    small = jnp.concatenate([
        row(lw["ln1_g"]), row(lw["ln1_b"]), row(lw["b_qkv"]), row(lw["b_o"]),
        row(lw["ln2_g"]), row(lw["ln2_b"]), row(lw["b1"]), row(lw["b2"]),
    ], axis=1).astype(jnp.float32)                         # (L, N_SMALL, MLP_DIM)

    # 5) big per-layer matmul weights streamed in bf16 (f32 accumulation in-kernel)
    wqkv = lw["w_qkv"].astype(jnp.bfloat16)                # (L, DIM, 3*DIM)
    wo = lw["w_o"].astype(jnp.bfloat16)                    # (L, DIM, DIM)
    w1 = lw["w1"].astype(jnp.bfloat16)                     # (L, DIM, MLP_DIM)
    w2 = lw["w2"].astype(jnp.bfloat16)                     # (L, MLP_DIM, DIM)

    out = pl.pallas_call(
        _flava_kernel,
        out_shape=jax.ShapeDtypeStruct((B, DIM), jnp.float32),
        grid=(BATCH_BLOCKS, NUM_LAYERS),
        in_specs=[
            pl.BlockSpec((BB * NPATCH, CPP), lambda bb, l: (bb, 0)),
            pl.BlockSpec((CPP, DIM), lambda bb, l: (0, 0)),
            pl.BlockSpec((N_CONST, DIM), lambda bb, l: (0, 0)),
            pl.BlockSpec((1, DIM, 3 * DIM), lambda bb, l: (l, 0, 0)),
            pl.BlockSpec((1, DIM, DIM), lambda bb, l: (l, 0, 0)),
            pl.BlockSpec((1, DIM, MLP_DIM), lambda bb, l: (l, 0, 0)),
            pl.BlockSpec((1, MLP_DIM, DIM), lambda bb, l: (l, 0, 0)),
            pl.BlockSpec((1, N_SMALL, MLP_DIM), lambda bb, l: (l, 0, 0)),
        ],
        out_specs=pl.BlockSpec((BB, DIM), lambda bb, l: (bb, 0)),
        scratch_shapes=[
            pltpu.VMEM((N_TOK, DIM), jnp.float32),   # resident activations
            pltpu.VMEM((N_TOK, DIM), jnp.float32),   # merged attention context
        ],
        compiler_params=pltpu.CompilerParams(
            dimension_semantics=("parallel", "arbitrary"),
            vmem_limit_bytes=32 * 1024 * 1024),
    )(patches, pw, consts, wqkv, wo, w1, w2, small)

    return out


# ------------------------------ param init ----------------------------------
def init_params(key):
    keys = iter(jax.random.split(key, 12))

    def nrm(shape, std=0.02):
        return jax.random.normal(next(keys), shape, jnp.float32) * std

    L = NUM_LAYERS
    return {
        "patch_w": nrm((CPP, DIM)),
        "patch_b": jnp.zeros((1, DIM), jnp.float32),
        "cls": nrm((1, 1, DIM)),
        "pos": nrm((1, SEQ, DIM)),
        "final_ln_g": jnp.ones((1, DIM), jnp.float32),
        "final_ln_b": jnp.zeros((1, DIM), jnp.float32),
        "layers": {
            "ln1_g": jnp.ones((L, DIM), jnp.float32),
            "ln1_b": jnp.zeros((L, DIM), jnp.float32),
            # fused QKV: columns [0:DIM]=Q, [DIM:2*DIM]=K, [2*DIM:3*DIM]=V,
            # each organized as heads x head_dim (HF layout).
            "w_qkv": nrm((L, DIM, 3 * DIM)),
            "b_qkv": jnp.zeros((L, 3 * DIM), jnp.float32),
            "w_o": nrm((L, DIM, DIM)),
            "b_o": jnp.zeros((L, DIM), jnp.float32),
            "ln2_g": jnp.ones((L, DIM), jnp.float32),
            "ln2_b": jnp.zeros((L, DIM), jnp.float32),
            "w1": nrm((L, DIM, MLP_DIM)),
            "b1": jnp.zeros((L, MLP_DIM), jnp.float32),
            "w2": nrm((L, MLP_DIM, DIM)),
            "b2": jnp.zeros((L, DIM), jnp.float32),
        },
    }


# --------------------------------- main --------------------------------------
if __name__ == "__main__":
    key = jax.random.PRNGKey(0)
    k_params, k_img = jax.random.split(key)
    params = init_params(k_params)
    # ImageNet-normalized RGB images, NCHW (matches the PyTorch module's input)
    images = jax.random.normal(k_img, (B, C, H, W), jnp.float32)

    forward = jax.jit(flava_image_encoder)
    feats = jax.block_until_ready(forward(images, params))

    assert feats.shape == (B, DIM), feats.shape
    assert bool(jnp.all(jnp.isfinite(feats)))
    print("KERNEL_OK")
</pallas_src>

<mosaic_0001>
module attributes {stable_mosaic.version = 11 : i64} {
  func.func @_flava_kernel(%arg0: i32, %arg1: i32, %arg2: memref<8x192xf32, #tpu.memory_space<vmem>>, %arg3: memref<192x32xf32, #tpu.memory_space<vmem>>, %arg4: memref<9x32xf32, #tpu.memory_space<vmem>>, %arg5: memref<1x32x96xbf16, #tpu.memory_space<vmem>>, %arg6: memref<1x32x32xbf16, #tpu.memory_space<vmem>>, %arg7: memref<1x32x128xbf16, #tpu.memory_space<vmem>>, %arg8: memref<1x128x32xbf16, #tpu.memory_space<vmem>>, %arg9: memref<1x8x128xf32, #tpu.memory_space<vmem>>, %arg10: memref<2x32xf32, #tpu.memory_space<vmem>>, %arg11: memref<10x32xf32, #tpu.memory_space<vmem>>, %arg12: memref<10x32xf32, #tpu.memory_space<vmem>>) attributes {dimension_semantics = [#tpu.dimension_semantics<parallel>, #tpu.dimension_semantics<arbitrary>], iteration_bounds = array<i64: 1, 2>, scalar_prefetch = 0 : i64, scratch_operands = 2 : i64, tpu.core_type = #tpu.core_type<tc>, window_params = [{transform_indices = @transform_0, window_bounds = array<i64: 8, 192>}, {pipeline_mode = #tpu.pipeline_mode<synchronous>, transform_indices = @transform_1, window_bounds = array<i64: 192, 32>}, {pipeline_mode = #tpu.pipeline_mode<synchronous>, transform_indices = @transform_2, window_bounds = array<i64: 9, 32>}, {transform_indices = @transform_3, window_bounds = array<i64: 1, 32, 96>}, {transform_indices = @transform_4, window_bounds = array<i64: 1, 32, 32>}, {transform_indices = @transform_5, window_bounds = array<i64: 1, 32, 128>}, {transform_indices = @transform_6, window_bounds = array<i64: 1, 128, 32>}, {transform_indices = @transform_7, window_bounds = array<i64: 1, 8, 128>}, {transform_indices = @transform_8, window_bounds = array<i64: 2, 32>}]} {
    %c0 = arith.constant 0 : index
    %c0_0 = arith.constant 0 : index
    %0 = vector.load %arg4[%c0, %c0_0] : memref<9x32xf32, #tpu.memory_space<vmem>>, vector<9x32xf32>
    %1 = vector.extract_strided_slice %0 {offsets = [0, 0], sizes = [1, 32], strides = [1, 1]} : vector<9x32xf32> to vector<1x32xf32>
    %2 = vector.extract_strided_slice %0 {offsets = [1, 0], sizes = [1, 32], strides = [1, 1]} : vector<9x32xf32> to vector<1x32xf32>
    %3 = vector.extract_strided_slice %0 {offsets = [2, 0], sizes = [1, 32], strides = [1, 1]} : vector<9x32xf32> to vector<1x32xf32>
    %4 = vector.extract_strided_slice %0 {offsets = [3, 0], sizes = [1, 32], strides = [1, 1]} : vector<9x32xf32> to vector<1x32xf32>
    %5 = vector.extract_strided_slice %0 {offsets = [4, 0], sizes = [1, 32], strides = [1, 1]} : vector<9x32xf32> to vector<1x32xf32>
    %6 = vector.extract_strided_slice %0 {offsets = [5, 0], sizes = [4, 32], strides = [1, 1]} : vector<9x32xf32> to vector<4x32xf32>
    %c0_i32 = arith.constant 0 : i32
    %7 = arith.cmpi eq, %arg1, %c0_i32 : i32
    %8 = arith.extui %7 : i1 to i32
    %c0_i32_1 = arith.constant 0 : i32
    %9 = arith.cmpi ne, %8, %c0_i32_1 : i32
    scf.if %9 {
      %c0_69 = arith.constant 0 : index
      %c0_70 = arith.constant 0 : index
      %225 = vector.load %arg2[%c0_69, %c0_70] : memref<8x192xf32, #tpu.memory_space<vmem>>, vector<8x192xf32>
      %c0_71 = arith.constant 0 : index
      %c0_72 = arith.constant 0 : index
      %226 = vector.load %arg3[%c0_71, %c0_72] : memref<192x32xf32, #tpu.memory_space<vmem>>, vector<192x32xf32>
      %cst_73 = arith.constant dense<0.000000e+00> : vector<8x32xf32>
      %227 = tpu.matmul %225, %226, %cst_73 {dimension_numbers = #tpu.dot_dimension_numbers<[1], [0], [0], [1], [0, 0, 1, 1], [], []>} : vector<8x192xf32>, vector<192x32xf32>, vector<8x32xf32> -> vector<8x32xf32>
      %228 = vector.broadcast %1 : vector<1x32xf32> to vector<8x32xf32>
      %229 = arith.addf %227, %228 : vector<8x32xf32>
      %230 = arith.addf %2, %5 : vector<1x32xf32>
      %c0_74 = arith.constant 0 : index
      %c0_75 = arith.constant 0 : index
      %231 = vector.load %arg11[%c0_74, %c0_75] : memref<10x32xf32, #tpu.memory_space<vmem>>, vector<1x32xf32>
      tpu.vector_store %arg11[%c0_74, %c0_75], %230 {strides = array<i32>} : memref<10x32xf32, #tpu.memory_space<vmem>>, vector<1x32xf32>,
      %232 = vector.extract_strided_slice %229 {offsets = [0, 0], sizes = [4, 32], strides = [1, 1]} : vector<8x32xf32> to vector<4x32xf32>
      %233 = arith.addf %232, %6 : vector<4x32xf32>
      %c1 = arith.constant 1 : index
      %c0_76 = arith.constant 0 : index
      %234 = vector.load %arg11[%c1, %c0_76] : memref<10x32xf32, #tpu.memory_space<vmem>>, vector<4x32xf32>
      tpu.vector_store %arg11[%c1, %c0_76], %233 {strides = array<i32>} : memref<10x32xf32, #tpu.memory_space<vmem>>, vector<4x32xf32>,
      %c5_77 = arith.constant 5 : index
      %c0_78 = arith.constant 0 : index
      %235 = vector.load %arg11[%c5_77, %c0_78] : memref<10x32xf32, #tpu.memory_space<vmem>>, vector<1x32xf32>
      tpu.vector_store %arg11[%c5_77, %c0_78], %230 {strides = array<i32>} : memref<10x32xf32, #tpu.memory_space<vmem>>, vector<1x32xf32>,
      %236 = vector.extract_strided_slice %229 {offsets = [4, 0], sizes = [4, 32], strides = [1, 1]} : vector<8x32xf32> to vector<4x32xf32>
      %237 = arith.addf %236, %6 : vector<4x32xf32>
      %c6 = arith.constant 6 : index
      %c0_79 = arith.constant 0 : index
      %238 = vector.load %arg11[%c6, %c0_79] : memref<10x32xf32, #tpu.memory_space<vmem>>, vector<4x32xf32>
      tpu.vector_store %arg11[%c6, %c0_79], %237 {strides = array<i32>} : memref<10x32xf32, #tpu.memory_space<vmem>>, vector<4x32xf32>,
    } else {
    }
    %c0_2 = arith.constant 0 : index
    %c0_3 = arith.constant 0 : index
    %c0_4 = arith.constant 0 : index
    %10 = vector.load %arg9[%c0_2, %c0_3, %c0_4] : memref<1x8x128xf32, #tpu.memory_space<vmem>>, vector<1x8x128xf32>
    %11 = vector.shape_cast %10 : vector<1x8x128xf32> to vector<8x128xf32>
    %12 = vector.extract_strided_slice %11 {offsets = [0, 0], sizes = [1, 32], strides = [1, 1]} : vector<8x128xf32> to vector<1x32xf32>
    %13 = vector.extract_strided_slice %11 {offsets = [1, 0], sizes = [1, 32], strides = [1, 1]} : vector<8x128xf32> to vector<1x32xf32>
    %14 = vector.extract_strided_slice %11 {offsets = [2, 0], sizes = [1, 96], strides = [1, 1]} : vector<8x128xf32> to vector<1x96xf32>
    %15 = vector.extract_strided_slice %11 {offsets = [3, 0], sizes = [1, 32], strides = [1, 1]} : vector<8x128xf32> to vector<1x32xf32>
    %16 = vector.extract_strided_slice %11 {offsets = [4, 0], sizes = [1, 32], strides = [1, 1]} : vector<8x128xf32> to vector<1x32xf32>
    %17 = vector.extract_strided_slice %11 {offsets = [5, 0], sizes = [1, 32], strides = [1, 1]} : vector<8x128xf32> to vector<1x32xf32>
    %18 = vector.extract_strided_slice %11 {offsets = [6, 0], sizes = [1, 128], strides = [1, 1]} : vector<8x128xf32> to vector<1x128xf32>
    %19 = vector.extract_strided_slice %11 {offsets = [7, 0], sizes = [1, 32], strides = [1, 1]} : vector<8x128xf32> to vector<1x32xf32>
    %c0_5 = arith.constant 0 : index
    %c0_6 = arith.constant 0 : index
    %20 = vector.load %arg11[%c0_5, %c0_6] : memref<10x32xf32, #tpu.memory_space<vmem>>, vector<10x32xf32>
    %cst = arith.constant dense<0.000000e+00> : vector<10xf32>
    %21 = vector.multi_reduction <add>, %20, %cst [1] : vector<10x32xf32> to vector<10xf32>
    %22 = vector.shape_cast %21 : vector<10xf32> to vector<10x1xf32>
    %cst_7 = arith.constant 3.200000e+01 : f32
    %23 = vector.broadcast %cst_7 : f32 to vector<10x1xf32>
    %24 = arith.divf %22, %23 : vector<10x1xf32>
    %25 = vector.broadcast %24 : vector<10x1xf32> to vector<10x32xf32>
    %26 = arith.subf %20, %25 : vector<10x32xf32>
    %27 = arith.mulf %26, %26 : vector<10x32xf32>
    %cst_8 = arith.constant dense<0.000000e+00> : vector<10xf32>
    %28 = vector.multi_reduction <add>, %27, %cst_8 [1] : vector<10x32xf32> to vector<10xf32>
    %29 = vector.shape_cast %28 : vector<10xf32> to vector<10x1xf32>
    %cst_9 = arith.constant 3.200000e+01 : f32
    %30 = vector.broadcast %cst_9 : f32 to vector<10x1xf32>
    %31 = arith.divf %29, %30 : vector<10x1xf32>
    %32 = vector.broadcast %24 : vector<10x1xf32> to vector<10x32xf32>
    %33 = arith.subf %20, %32 : vector<10x32xf32>
    %cst_10 = arith.constant 9.99999996E-13 : f32
    %34 = vector.broadcast %cst_10 : f32 to vector<10x1xf32>
    %35 = arith.addf %31, %34 : vector<10x1xf32>
    %36 = math.rsqrt %35 : vector<10x1xf32>
    %37 = vector.broadcast %36 : vector<10x1xf32> to vector<10x32xf32>
    %38 = arith.mulf %33, %37 : vector<10x32xf32>
    %39 = vector.broadcast %12 : vector<1x32xf32> to vector<10x32xf32>
    %40 = arith.mulf %38, %39 : vector<10x32xf32>
    %41 = vector.broadcast %13 : vector<1x32xf32> to vector<10x32xf32>
    %42 = arith.addf %40, %41 : vector<10x32xf32>
    %43 = arith.truncf %42 : vector<10x32xf32> to vector<10x32xbf16>
    %c0_11 = arith.constant 0 : index
    %c0_12 = arith.constant 0 : index
    %c0_13 = arith.constant 0 : index
    %44 = vector.load %arg5[%c0_11, %c0_12, %c0_13] : memref<1x32x96xbf16, #tpu.memory_space<vmem>>, vector<1x32x96xbf16>
    %45 = vector.shape_cast %44 : vector<1x32x96xbf16> to vector<32x96xbf16>
    %cst_14 = arith.constant dense<0.000000e+00> : vector<10x96xf32>
    %46 = tpu.matmul %43, %45, %cst_14 {dimension_numbers = #tpu.dot_dimension_numbers<[1], [0], [0], [1], [0, 0, 1, 1], [], []>} : vector<10x32xbf16>, vector<32x96xbf16>, vector<10x96xf32> -> vector<10x96xf32>
    %47 = vector.broadcast %14 : vector<1x96xf32> to vector<10x96xf32>
    %48 = arith.addf %46, %47 : vector<10x96xf32>
    %49 = vector.extract_strided_slice %48 {offsets = [0, 0], sizes = [5, 8], strides = [1, 1]} : vector<10x96xf32> to vector<5x8xf32>
    %50 = vector.extract_strided_slice %48 {offsets = [0, 8], sizes = [5, 8], strides = [1, 1]} : vector<10x96xf32> to vector<5x8xf32>
    %51 = vector.extract_strided_slice %48 {offsets = [0, 16], sizes = [5, 8], strides = [1, 1]} : vector<10x96xf32> to vector<5x8xf32>
    %52 = vector.extract_strided_slice %48 {offsets = [0, 24], sizes = [5, 8], strides = [1, 1]} : vector<10x96xf32> to vector<5x8xf32>
    %53 = vector.extract_strided_slice %48 {offsets = [5, 0], sizes = [5, 8], strides = [1, 1]} : vector<10x96xf32> to vector<5x8xf32>
    %54 = vector.extract_strided_slice %48 {offsets = [5, 8], sizes = [5, 8], strides = [1, 1]} : vector<10x96xf32> to vector<5x8xf32>
    %55 = vector.extract_strided_slice %48 {offsets = [5, 16], sizes = [5, 8], strides = [1, 1]} : vector<10x96xf32> to vector<5x8xf32>
    %56 = vector.extract_strided_slice %48 {offsets = [5, 24], sizes = [5, 8], strides = [1, 1]} : vector<10x96xf32> to vector<5x8xf32>
    %57 = vector.shape_cast %49 : vector<5x8xf32> to vector<1x5x8xf32>
    %58 = vector.shape_cast %50 : vector<5x8xf32> to vector<1x5x8xf32>
    %59 = vector.shape_cast %51 : vector<5x8xf32> to vector<1x5x8xf32>
    %60 = vector.shape_cast %52 : vector<5x8xf32> to vector<1x5x8xf32>
    %61 = vector.shape_cast %53 : vector<5x8xf32> to vector<1x5x8xf32>
    %62 = vector.shape_cast %54 : vector<5x8xf32> to vector<1x5x8xf32>
    %63 = vector.shape_cast %55 : vector<5x8xf32> to vector<1x5x8xf32>
    %64 = vector.shape_cast %56 : vector<5x8xf32> to vector<1x5x8xf32>
    %65 = tpu.concatenate %57, %58, %59, %60, %61, %62, %63, %64 in 0 : vector<1x5x8xf32>, vector<1x5x8xf32>, vector<1x5x8xf32>, vector<1x5x8xf32>, vector<1x5x8xf32>, vector<1x5x8xf32>, vector<1x5x8xf32>, vector<1x5x8xf32> -> vector<8x5x8xf32>
    %66 = vector.extract_strided_slice %48 {offsets = [0, 32], sizes = [5, 8], strides = [1, 1]} : vector<10x96xf32> to vector<5x8xf32>
    %67 = vector.extract_strided_slice %48 {offsets = [0, 40], sizes = [5, 8], strides = [1, 1]} : vector<10x96xf32> to vector<5x8xf32>
    %68 = vector.extract_strided_slice %48 {offsets = [0, 48], sizes = [5, 8], strides = [1, 1]} : vector<10x96xf32> to vector<5x8xf32>
    %69 = vector.extract_strided_slice %48 {offsets = [0, 56], sizes = [5, 8], strides = [1, 1]} : vector<10x96xf32> to vector<5x8xf32>
    %70 = vector.extract_strided_slice %48 {offsets = [5, 32], sizes = [5, 8], strides = [1, 1]} : vector<10x96xf32> to vector<5x8xf32>
    %71 = vector.extract_strided_slice %48 {offsets = [5, 40], sizes = [5, 8], strides = [1, 1]} : vector<10x96xf32> to vector<5x8xf32>
    %72 = vector.extract_strided_slice %48 {offsets = [5, 48], sizes = [5, 8], strides = [1, 1]} : vector<10x96xf32> to vector<5x8xf32>
    %73 = vector.extract_strided_slice %48 {offsets = [5, 56], sizes = [5, 8], strides = [1, 1]} : vector<10x96xf32> to vector<5x8xf32>
    %74 = vector.shape_cast %66 : vector<5x8xf32> to vector<1x5x8xf32>
    %75 = vector.shape_cast %67 : vector<5x8xf32> to vector<1x5x8xf32>
    %76 = vector.shape_cast %68 : vector<5x8xf32> to vector<1x5x8xf32>
    %77 = vector.shape_cast %69 : vector<5x8xf32> to vector<1x5x8xf32>
    %78 = vector.shape_cast %70 : vector<5x8xf32> to vector<1x5x8xf32>
    %79 = vector.shape_cast %71 : vector<5x8xf32> to vector<1x5x8xf32>
    %80 = vector.shape_cast %72 : vector<5x8xf32> to vector<1x5x8xf32>
    %81 = vector.shape_cast %73 : vector<5x8xf32> to vector<1x5x8xf32>
    %82 = tpu.concatenate %74, %75, %76, %77, %78, %79, %80, %81 in 0 : vector<1x5x8xf32>, vector<1x5x8xf32>, vector<1x5x8xf32>, vector<1x5x8xf32>, vector<1x5x8xf32>, vector<1x5x8xf32>, vector<1x5x8xf32>, vector<1x5x8xf32> -> vector<8x5x8xf32>
    %83 = vector.extract_strided_slice %48 {offsets = [0, 64], sizes = [5, 8], strides = [1, 1]} : vector<10x96xf32> to vector<5x8xf32>
    %84 = vector.extract_strided_slice %48 {offsets = [0, 72], sizes = [5, 8], strides = [1, 1]} : vector<10x96xf32> to vector<5x8xf32>
    %85 = vector.extract_strided_slice %48 {offsets = [0, 80], sizes = [5, 8], strides = [1, 1]} : vector<10x96xf32> to vector<5x8xf32>
    %86 = vector.extract_strided_slice %48 {offsets = [0, 88], sizes = [5, 8], strides = [1, 1]} : vector<10x96xf32> to vector<5x8xf32>
    %87 = vector.extract_strided_slice %48 {offsets = [5, 64], sizes = [5, 8], strides = [1, 1]} : vector<10x96xf32> to vector<5x8xf32>
    %88 = vector.extract_strided_slice %48 {offsets = [5, 72], sizes = [5, 8], strides = [1, 1]} : vector<10x96xf32> to vector<5x8xf32>
    %89 = vector.extract_strided_slice %48 {offsets = [5, 80], sizes = [5, 8], strides = [1, 1]} : vector<10x96xf32> to vector<5x8xf32>
    %90 = vector.extract_strided_slice %48 {offsets = [5, 88], sizes = [5, 8], strides = [1, 1]} : vector<10x96xf32> to vector<5x8xf32>
    %91 = vector.shape_cast %83 : vector<5x8xf32> to vector<1x5x8xf32>
    %92 = vector.shape_cast %84 : vector<5x8xf32> to vector<1x5x8xf32>
    %93 = vector.shape_cast %85 : vector<5x8xf32> to vector<1x5x8xf32>
    %94 = vector.shape_cast %86 : vector<5x8xf32> to vector<1x5x8xf32>
    %95 = vector.shape_cast %87 : vector<5x8xf32> to vector<1x5x8xf32>
    %96 = vector.shape_cast %88 : vector<5x8xf32> to vector<1x5x8xf32>
    %97 = vector.shape_cast %89 : vector<5x8xf32> to vector<1x5x8xf32>
    %98 = vector.shape_cast %90 : vector<5x8xf32> to vector<1x5x8xf32>
    %99 = tpu.concatenate %91, %92, %93, %94, %95, %96, %97, %98 in 0 : vector<1x5x8xf32>, vector<1x5x8xf32>, vector<1x5x8xf32>, vector<1x5x8xf32>, vector<1x5x8xf32>, vector<1x5x8xf32>, vector<1x5x8xf32>, vector<1x5x8xf32> -> vector<8x5x8xf32>
    "tpu.trace_start"() <{level = 10 : i32, message = "gqe,gke->gqk"}> : () -> ()
    %cst_15 = arith.constant dense<0.000000e+00> : vector<8x5x5xf32>
    %100 = tpu.matmul %65, %82, %cst_15 {dimension_numbers = #tpu.dot_dimension_numbers<[2], [2], [1], [1], [0, 0, 0, 1, 1, 1], [0], [0]>} : vector<8x5x8xf32>, vector<8x5x8xf32>, vector<8x5x5xf32> -> vector<8x5x5xf32>
    "tpu.trace_stop"() : () -> ()
    %cst_16 = arith.constant 0.353553385 : f32
    %101 = vector.broadcast %cst_16 : f32 to vector<8x5x5xf32>
    %102 = arith.mulf %100, %101 : vector<8x5x5xf32>
    %cst_17 = arith.constant dense<0xFF800000> : vector<8x5xf32>
    %103 = vector.multi_reduction <maximumf>, %102, %cst_17 [2] : vector<8x5x5xf32> to vector<8x5xf32>
    %104 = vector.shape_cast %103 : vector<8x5xf32> to vector<8x5x1xf32>
    %105 = vector.broadcast %104 : vector<8x5x1xf32> to vector<8x5x5xf32>
    %106 = arith.subf %102, %105 : vector<8x5x5xf32>
    %107 = math.exp %106 : vector<8x5x5xf32>
    %cst_18 = arith.constant dense<0.000000e+00> : vector<8x5xf32>
    %108 = vector.multi_reduction <add>, %107, %cst_18 [2] : vector<8x5x5xf32> to vector<8x5xf32>
    %109 = vector.shape_cast %108 : vector<8x5xf32> to vector<8x5x1xf32>
    %110 = tpu.reciprocal %109 {approx = true} : vector<8x5x1xf32> -> vector<8x5x1xf32>
    %111 = vector.broadcast %110 : vector<8x5x1xf32> to vector<8x5x5xf32>
    %112 = arith.mulf %107, %111 : vector<8x5x5xf32>
    "tpu.trace_start"() <{level = 10 : i32, message = "gqk,gke->gqe"}> : () -> ()
    %cst_19 = arith.constant dense<0.000000e+00> : vector<8x5x8xf32>
    %113 = tpu.matmul %112, %99, %cst_19 {dimension_numbers = #tpu.dot_dimension_numbers<[2], [1], [1], [2], [0, 0, 0, 1, 1, 2], [0], [0]>} : vector<8x5x5xf32>, vector<8x5x8xf32>, vector<8x5x8xf32> -> vector<8x5x8xf32>
    "tpu.trace_stop"() : () -> ()
    %114 = vector.extract_strided_slice %113 {offsets = [0, 0, 0], sizes = [1, 5, 8], strides = [1, 1, 1]} : vector<8x5x8xf32> to vector<1x5x8xf32>
    %115 = vector.shape_cast %114 : vector<1x5x8xf32> to vector<5x8xf32>
    %c0_20 = arith.constant 0 : index
    %c0_21 = arith.constant 0 : index
    %116 = vector.load %arg12[%c0_20, %c0_21] : memref<10x32xf32, #tpu.memory_space<vmem>>, vector<5x8xf32>
    tpu.vector_store %arg12[%c0_20, %c0_21], %115 {strides = array<i32>} : memref<10x32xf32, #tpu.memory_space<vmem>>, vector<5x8xf32>,
    %117 = vector.extract_strided_slice %113 {offsets = [1, 0, 0], sizes = [1, 5, 8], strides = [1, 1, 1]} : vector<8x5x8xf32> to vector<1x5x8xf32>
    %118 = vector.shape_cast %117 : vector<1x5x8xf32> to vector<5x8xf32>
    %c0_22 = arith.constant 0 : index
    %c8 = arith.constant 8 : index
    %119 = vector.load %arg12[%c0_22, %c8] : memref<10x32xf32, #tpu.memory_space<vmem>>, vector<5x8xf32>
    tpu.vector_store %arg12[%c0_22, %c8], %118 {strides = array<i32>} : memref<10x32xf32, #tpu.memory_space<vmem>>, vector<5x8xf32>,
    %120 = vector.extract_strided_slice %113 {offsets = [2, 0, 0], sizes = [1, 5, 8], strides = [1, 1, 1]} : vector<8x5x8xf32> to vector<1x5x8xf32>
    %121 = vector.shape_cast %120 : vector<1x5x8xf32> to vector<5x8xf32>
    %c0_23 = arith.constant 0 : index
    %c16 = arith.constant 16 : index
    %122 = vector.load %arg12[%c0_23, %c16] : memref<10x32xf32, #tpu.memory_space<vmem>>, vector<5x8xf32>
    tpu.vector_store %arg12[%c0_23, %c16], %121 {strides = array<i32>} : memref<10x32xf32, #tpu.memory_space<vmem>>, vector<5x8xf32>,
    %123 = vector.extract_strided_slice %113 {offsets = [3, 0, 0], sizes = [1, 5, 8], strides = [1, 1, 1]} : vector<8x5x8xf32> to vector<1x5x8xf32>
    %124 = vector.shape_cast %123 : vector<1x5x8xf32> to vector<5x8xf32>
    %c0_24 = arith.constant 0 : index
    %c24 = arith.constant 24 : index
    %125 = vector.load %arg12[%c0_24, %c24] : memref<10x32xf32, #tpu.memory_space<vmem>>, vector<5x8xf32>
    tpu.vector_store %arg12[%c0_24, %c24], %124 {strides = array<i32>} : memref<10x32xf32, #tpu.memory_space<vmem>>, vector<5x8xf32>,
    %126 = vector.extract_strided_slice %113 {offsets = [4, 0, 0], sizes = [1, 5, 8], strides = [1, 1, 1]} : vector<8x5x8xf32> to vector<1x5x8xf32>
    %127 = vector.shape_cast %126 : vector<1x5x8xf32> to vector<5x8xf32>
    %c5 = arith.constant 5 : index
    %c0_25 = arith.constant 0 : index
    %128 = vector.load %arg12[%c5, %c0_25] : memref<10x32xf32, #tpu.memory_space<vmem>>, vector<5x8xf32>
    tpu.vector_store %arg12[%c5, %c0_25], %127 {strides = array<i32>} : memref<10x32xf32, #tpu.memory_space<vmem>>, vector<5x8xf32>,
    %129 = vector.extract_strided_slice %113 {offsets = [5, 0, 0], sizes = [1, 5, 8], strides = [1, 1, 1]} : vector<8x5x8xf32> to vector<1x5x8xf32>
    %130 = vector.shape_cast %129 : vector<1x5x8xf32> to vector<5x8xf32>
    %c5_26 = arith.constant 5 : index
    %c8_27 = arith.constant 8 : index
    %131 = vector.load %arg12[%c5_26, %c8_27] : memref<10x32xf32, #tpu.memory_space<vmem>>, vector<5x8xf32>
    tpu.vector_store %arg12[%c5_26, %c8_27], %130 {strides = array<i32>} : memref<10x32xf32, #tpu.memory_space<vmem>>, vector<5x8xf32>,
    %132 = vector.extract_strided_slice %113 {offsets = [6, 0, 0], sizes = [1, 5, 8], strides = [1, 1, 1]} : vector<8x5x8xf32> to vector<1x5x8xf32>
    %133 = vector.shape_cast %132 : vector<1x5x8xf32> to vector<5x8xf32>
    %c5_28 = arith.constant 5 : index
    %c16_29 = arith.constant 16 : index
    %134 = vector.load %arg12[%c5_28, %c16_29] : memref<10x32xf32, #tpu.memory_space<vmem>>, vector<5x8xf32>
    tpu.vector_store %arg12[%c5_28, %c16_29], %133 {strides = array<i32>} : memref<10x32xf32, #tpu.memory_space<vmem>>, vector<5x8xf32>,
    %135 = vector.extract_strided_slice %113 {offsets = [7, 0, 0], sizes = [1, 5, 8], strides = [1, 1, 1]} : vector<8x5x8xf32> to vector<1x5x8xf32>
    %136 = vector.shape_cast %135 : vector<1x5x8xf32> to vector<5x8xf32>
    %c5_30 = arith.constant 5 : index
    %c24_31 = arith.constant 24 : index
    %137 = vector.load %arg12[%c5_30, %c24_31] : memref<10x32xf32, #tpu.memory_space<vmem>>, vector<5x8xf32>
    tpu.vector_store %arg12[%c5_30, %c24_31], %136 {strides = array<i32>} : memref<10x32xf32, #tpu.memory_space<vmem>>, vector<5x8xf32>,
    %c0_32 = arith.constant 0 : index
    %c0_33 = arith.constant 0 : index
    %138 = vector.load %arg12[%c0_32, %c0_33] : memref<10x32xf32, #tpu.memory_space<vmem>>, vector<10x32xf32>
    %139 = arith.truncf %138 : vector<10x32xf32> to vector<10x32xbf16>
    %c0_34 = arith.constant 0 : index
    %c0_35 = arith.constant 0 : index
    %c0_36 = arith.constant 0 : index
    %140 = vector.load %arg6[%c0_34, %c0_35, %c0_36] : memref<1x32x32xbf16, #tpu.memory_space<vmem>>, vector<1x32x32xbf16>
    %141 = vector.shape_cast %140 : vector<1x32x32xbf16> to vector<32x32xbf16>
    %cst_37 = arith.constant dense<0.000000e+00> : vector<10x32xf32>
    %142 = tpu.matmul %139, %141, %cst_37 {dimension_numbers = #tpu.dot_dimension_numbers<[1], [0], [0], [1], [0, 0, 1, 1], [], []>} : vector<10x32xbf16>, vector<32x32xbf16>, vector<10x32xf32> -> vector<10x32xf32>
    %143 = vector.broadcast %15 : vector<1x32xf32> to vector<10x32xf32>
    %144 = arith.addf %142, %143 : vector<10x32xf32>
    %145 = arith.addf %20, %144 : vector<10x32xf32>
    %cst_38 = arith.constant dense<0.000000e+00> : vector<10xf32>
    %146 = vector.multi_reduction <add>, %145, %cst_38 [1] : vector<10x32xf32> to vector<10xf32>
    %147 = vector.shape_cast %146 : vector<10xf32> to vector<10x1xf32>
    %cst_39 = arith.constant 3.200000e+01 : f32
    %148 = vector.broadcast %cst_39 : f32 to vector<10x1xf32>
    %149 = arith.divf %147, %148 : vector<10x1xf32>
    %150 = vector.broadcast %149 : vector<10x1xf32> to vector<10x32xf32>
    %151 = arith.subf %145, %150 : vector<10x32xf32>
    %152 = arith.mulf %151, %151 : vector<10x32xf32>
    %cst_40 = arith.constant dense<0.000000e+00> : vector<10xf32>
    %153 = vector.multi_reduction <add>, %152, %cst_40 [1] : vector<10x32xf32> to vector<10xf32>
    %154 = vector.shape_cast %153 : vector<10xf32> to vector<10x1xf32>
    %cst_41 = arith.constant 3.200000e+01 : f32
    %155 = vector.broadcast %cst_41 : f32 to vector<10x1xf32>
    %156 = arith.divf %154, %155 : vector<10x1xf32>
    %157 = vector.broadcast %149 : vector<10x1xf32> to vector<10x32xf32>
    %158 = arith.subf %145, %157 : vector<10x32xf32>
    %cst_42 = arith.constant 9.99999996E-13 : f32
    %159 = vector.broadcast %cst_42 : f32 to vector<10x1xf32>
    %160 = arith.addf %156, %159 : vector<10x1xf32>
    %161 = math.rsqrt %160 : vector<10x1xf32>
    %162 = vector.broadcast %161 : vector<10x1xf32> to vector<10x32xf32>
    %163 = arith.mulf %158, %162 : vector<10x32xf32>
    %164 = vector.broadcast %16 : vector<1x32xf32> to vector<10x32xf32>
    %165 = arith.mulf %163, %164 : vector<10x32xf32>
    %166 = vector.broadcast %17 : vector<1x32xf32> to vector<10x32xf32>
    %167 = arith.addf %165, %166 : vector<10x32xf32>
    %168 = arith.truncf %167 : vector<10x32xf32> to vector<10x32xbf16>
    %c0_43 = arith.constant 0 : index
    %c0_44 = arith.constant 0 : index
    %c0_45 = arith.constant 0 : index
    %169 = vector.load %arg7[%c0_43, %c0_44, %c0_45] : memref<1x32x128xbf16, #tpu.memory_space<vmem>>, vector<1x32x128xbf16>
    %170 = vector.shape_cast %169 : vector<1x32x128xbf16> to vector<32x128xbf16>
    %cst_46 = arith.constant dense<0.000000e+00> : vector<10x128xf32>
    %171 = tpu.matmul %168, %170, %cst_46 {dimension_numbers = #tpu.dot_dimension_numbers<[1], [0], [0], [1], [0, 0, 1, 1], [], []>} : vector<10x32xbf16>, vector<32x128xbf16>, vector<10x128xf32> -> vector<10x128xf32>
    %172 = vector.broadcast %18 : vector<1x128xf32> to vector<10x128xf32>
    %173 = arith.addf %171, %172 : vector<10x128xf32>
    %cst_47 = arith.constant 5.000000e-01 : f32
    %174 = vector.broadcast %cst_47 : f32 to vector<10x128xf32>
    %175 = arith.mulf %174, %173 : vector<10x128xf32>
    %cst_48 = arith.constant 0.707106769 : f32
    %176 = vector.broadcast %cst_48 : f32 to vector<10x128xf32>
    %177 = arith.mulf %173, %176 : vector<10x128xf32>
    %cst_49 = arith.constant 0.000000e+00 : f32
    %178 = vector.broadcast %cst_49 : f32 to vector<10x128xf32>
    %179 = arith.cmpf oge, %177, %178 : vector<10x128xf32>
    %cst_50 = arith.constant 1.000000e+00 : f32
    %cst_51 = arith.constant -1.000000e+00 : f32
    %180 = vector.broadcast %cst_50 : f32 to vector<10x128xf32>
    %181 = vector.broadcast %cst_51 : f32 to vector<10x128xf32>
    %182 = arith.select %179, %180, %181 : vector<10x128xi1>, vector<10x128xf32>
    %183 = math.absf %177 : vector<10x128xf32>
    %cst_52 = arith.constant 0.327591091 : f32
    %184 = vector.broadcast %cst_52 : f32 to vector<10x128xf32>
    %185 = arith.mulf %184, %183 : vector<10x128xf32>
    %cst_53 = arith.constant 1.000000e+00 : f32
    %186 = vector.broadcast %cst_53 : f32 to vector<10x128xf32>
    %187 = arith.addf %186, %185 : vector<10x128xf32>
    %188 = tpu.reciprocal %187 : vector<10x128xf32> -> vector<10x128xf32>
    %cst_54 = arith.constant 1.06140542 : f32
    %189 = vector.broadcast %cst_54 : f32 to vector<10x128xf32>
    %190 = arith.mulf %189, %188 : vector<10x128xf32>
    %cst_55 = arith.constant -1.45315206 : f32
    %191 = vector.broadcast %cst_55 : f32 to vector<10x128xf32>
    %192 = arith.addf %190, %191 : vector<10x128xf32>
    %193 = arith.mulf %192, %188 : vector<10x128xf32>
    %cst_56 = arith.constant 1.42141378 : f32
    %194 = vector.broadcast %cst_56 : f32 to vector<10x128xf32>
    %195 = arith.addf %193, %194 : vector<10x128xf32>
    %196 = arith.mulf %195, %188 : vector<10x128xf32>
    %cst_57 = arith.constant -0.284496725 : f32
    %197 = vector.broadcast %cst_57 : f32 to vector<10x128xf32>
    %198 = arith.addf %196, %197 : vector<10x128xf32>
    %199 = arith.mulf %198, %188 : vector<10x128xf32>
    %cst_58 = arith.constant 0.254829586 : f32
    %200 = vector.broadcast %cst_58 : f32 to vector<10x128xf32>
    %201 = arith.addf %199, %200 : vector<10x128xf32>
    %202 = arith.mulf %201, %188 : vector<10x128xf32>
    %cst_59 = arith.constant 0.000000e+00 : f32
    %203 = vector.broadcast %cst_59 : f32 to vector<10x128xf32>
    %204 = arith.subf %203, %183 : vector<10x128xf32>
    %205 = arith.mulf %204, %183 : vector<10x128xf32>
    %206 = math.exp %205 : vector<10x128xf32>
    %207 = arith.mulf %202, %206 : vector<10x128xf32>
    %cst_60 = arith.constant 1.000000e+00 : f32
    %208 = vector.broadcast %cst_60 : f32 to vector<10x128xf32>
    %209 = arith.subf %208, %207 : vector<10x128xf32>
    %210 = arith.mulf %182, %209 : vector<10x128xf32>
    %cst_61 = arith.constant 1.000000e+00 : f32
    %211 = vector.broadcast %cst_61 : f32 to vector<10x128xf32>
    %212 = arith.addf %211, %210 : vector<10x128xf32>
    %213 = arith.mulf %175, %212 : vector<10x128xf32>
    %214 = arith.truncf %213 : vector<10x128xf32> to vector<10x128xbf16>
    %c0_62 = arith.constant 0 : index
    %c0_63 = arith.constant 0 : index
    %c0_64 = arith.constant 0 : index
    %215 = vector.load %arg8[%c0_62, %c0_63, %c0_64] : memref<1x128x32xbf16, #tpu.memory_space<vmem>>, vector<1x128x32xbf16>
    %216 = vector.shape_cast %215 : vector<1x128x32xbf16> to vector<128x32xbf16>
    %cst_65 = arith.constant dense<0.000000e+00> : vector<10x32xf32>
    %217 = tpu.matmul %214, %216, %cst_65 {dimension_numbers = #tpu.dot_dimension_numbers<[1], [0], [0], [1], [0, 0, 1, 1], [], []>} : vector<10x128xbf16>, vector<128x32xbf16>, vector<10x32xf32> -> vector<10x32xf32>
    %218 = vector.broadcast %19 : vector<1x32xf32> to vector<10x32xf32>
    %219 = arith.addf %217, %218 : vector<10x32xf32>
    %220 = arith.addf %145, %219 : vector<10x32xf32>
    %c0_66 = arith.constant 0 : index
    %c0_67 = arith.constant 0 : index
    %221 = vector.load %arg11[%c0_66, %c0_67] : memref<10x32xf32, #tpu.memory_space<vmem>>, vector<10x32xf32>
    tpu.vector_store %arg11[%c0_66, %c0_67], %220 {strides = array<i32>} : memref<10x32xf32, #tpu.memory_space<vmem>>, vector<10x32xf32>,
    %c1_i32 = arith.constant 1 : i32
    %222 = arith.cmpi eq, %arg1, %c1_i32 : i32
    %223 = arith.extui %222 : i1 to i32
    %c0_i32_68 = arith.constant 0 : i32
    %224 = arith.cmpi ne, %223, %c0_i32_68 : i32
    scf.if %224 {
      %225 = vector.extract_strided_slice %220 {offsets = [0, 0], sizes = [1, 32], strides = [1, 1]} : vector<10x32xf32> to vector<1x32xf32>
      %cst_69 = arith.constant dense<0.000000e+00> : vector<1xf32>
      %226 = vector.multi_reduction <add>, %225, %cst_69 [1] : vector<1x32xf32> to vector<1xf32>
      %227 = vector.shape_cast %226 : vector<1xf32> to vector<1x1xf32>
      %cst_70 = arith.constant 3.200000e+01 : f32
      %228 = vector.broadcast %cst_70 : f32 to vector<1x1xf32>
      %229 = arith.divf %227, %228 : vector<1x1xf32>
      %230 = vector.broadcast %229 : vector<1x1xf32> to vector<1x32xf32>
      %231 = arith.subf %225, %230 : vector<1x32xf32>
      %232 = arith.mulf %231, %231 : vector<1x32xf32>
      %cst_71 = arith.constant dense<0.000000e+00> : vector<1xf32>
      %233 = vector.multi_reduction <add>, %232, %cst_71 [1] : vector<1x32xf32> to vector<1xf32>
      %234 = vector.shape_cast %233 : vector<1xf32> to vector<1x1xf32>
      %cst_72 = arith.constant 3.200000e+01 : f32
      %235 = vector.broadcast %cst_72 : f32 to vector<1x1xf32>
      %236 = arith.divf %234, %235 : vector<1x1xf32>
      %237 = vector.broadcast %229 : vector<1x1xf32> to vector<1x32xf32>
      %238 = arith.subf %225, %237 : vector<1x32xf32>
      %cst_73 = arith.constant 9.99999996E-13 : f32
      %239 = vector.broadcast %cst_73 : f32 to vector<1x1xf32>
      %240 = arith.addf %236, %239 : vector<1x1xf32>
      %241 = math.rsqrt %240 : vector<1x1xf32>
      %242 = vector.broadcast %241 : vector<1x1xf32> to vector<1x32xf32>
      %243 = arith.mulf %238, %242 : vector<1x32xf32>
      %244 = arith.mulf %243, %3 : vector<1x32xf32>
      %245 = arith.addf %244, %4 : vector<1x32xf32>
      %c0_74 = arith.constant 0 : index
      %c0_75 = arith.constant 0 : index
      %246 = vector.load %arg10[%c0_74, %c0_75] : memref<2x32xf32, #tpu.memory_space<vmem>>, vector<1x32xf32>
      tpu.vector_store %arg10[%c0_74, %c0_75], %245 {strides = array<i32>} : memref<2x32xf32, #tpu.memory_space<vmem>>, vector<1x32xf32>,
      %247 = vector.extract_strided_slice %220 {offsets = [5, 0], sizes = [1, 32], strides = [1, 1]} : vector<10x32xf32> to vector<1x32xf32>
      %cst_76 = arith.constant dense<0.000000e+00> : vector<1xf32>
      %248 = vector.multi_reduction <add>, %247, %cst_76 [1] : vector<1x32xf32> to vector<1xf32>
      %249 = vector.shape_cast %248 : vector<1xf32> to vector<1x1xf32>
      %cst_77 = arith.constant 3.200000e+01 : f32
      %250 = vector.broadcast %cst_77 : f32 to vector<1x1xf32>
      %251 = arith.divf %249, %250 : vector<1x1xf32>
      %252 = vector.broadcast %251 : vector<1x1xf32> to vector<1x32xf32>
      %253 = arith.subf %247, %252 : vector<1x32xf32>
      %254 = arith.mulf %253, %253 : vector<1x32xf32>
      %cst_78 = arith.constant dense<0.000000e+00> : vector<1xf32>
      %255 = vector.multi_reduction <add>, %254, %cst_78 [1] : vector<1x32xf32> to vector<1xf32>
      %256 = vector.shape_cast %255 : vector<1xf32> to vector<1x1xf32>
      %cst_79 = arith.constant 3.200000e+01 : f32
      %257 = vector.broadcast %cst_79 : f32 to vector<1x1xf32>
      %258 = arith.divf %256, %257 : vector<1x1xf32>
      %259 = vector.broadcast %251 : vector<1x1xf32> to vector<1x32xf32>
      %260 = arith.subf %247, %259 : vector<1x32xf32>
      %cst_80 = arith.constant 9.99999996E-13 : f32
      %261 = vector.broadcast %cst_80 : f32 to vector<1x1xf32>
      %262 = arith.addf %258, %261 : vector<1x1xf32>
      %263 = math.rsqrt %262 : vector<1x1xf32>
      %264 = vector.broadcast %263 : vector<1x1xf32> to vector<1x32xf32>
      %265 = arith.mulf %260, %264 : vector<1x32xf32>
      %266 = arith.mulf %265, %3 : vector<1x32xf32>
      %267 = arith.addf %266, %4 : vector<1x32xf32>
      %c1 = arith.constant 1 : index
      %c0_81 = arith.constant 0 : index
      %268 = vector.load %arg10[%c1, %c0_81] : memref<2x32xf32, #tpu.memory_space<vmem>>, vector<1x32xf32>
      tpu.vector_store %arg10[%c1, %c0_81], %267 {strides = array<i32>} : memref<2x32xf32, #tpu.memory_space<vmem>>, vector<1x32xf32>,
    } else {
    }
    return
  }
  func.func @transform_0(%arg0: i32, %arg1: i32) -> (i32, i32) {
    %c0_i32 = arith.constant 0 : i32
    %c0_i32_0 = arith.constant 0 : i32
    return %arg0, %c0_i32 : i32, i32
  }
  func.func @transform_1(%arg0: i32, %arg1: i32) -> (i32, i32) {
    %c0_i32 = arith.constant 0 : i32
    %c0_i32_0 = arith.constant 0 : i32
    %c0_i32_1 = arith.constant 0 : i32
    return %c0_i32, %c0_i32_0 : i32, i32
  }
  func.func @transform_2(%arg0: i32, %arg1: i32) -> (i32, i32) {
    %c0_i32 = arith.constant 0 : i32
    %c0_i32_0 = arith.constant 0 : i32
    %c0_i32_1 = arith.constant 0 : i32
    return %c0_i32, %c0_i32_0 : i32, i32
  }
  func.func @transform_3(%arg0: i32, %arg1: i32) -> (i32, i32, i32) {
    %c0_i32 = arith.constant 0 : i32
    %c0_i32_0 = arith.constant 0 : i32
    %c0_i32_1 = arith.constant 0 : i32
    return %arg1, %c0_i32, %c0_i32_0 : i32, i32, i32
  }
  func.func @transform_4(%arg0: i32, %arg1: i32) -> (i32, i32, i32) {
    %c0_i32 = arith.constant 0 : i32
    %c0_i32_0 = arith.constant 0 : i32
    %c0_i32_1 = arith.constant 0 : i32
    return %arg1, %c0_i32, %c0_i32_0 : i32, i32, i32
  }
  func.func @transform_5(%arg0: i32, %arg1: i32) -> (i32, i32, i32) {
    %c0_i32 = arith.constant 0 : i32
    %c0_i32_0 = arith.constant 0 : i32
    %c0_i32_1 = arith.constant 0 : i32
    return %arg1, %c0_i32, %c0_i32_0 : i32, i32, i32
  }
  func.func @transform_6(%arg0: i32, %arg1: i32) -> (i32, i32, i32) {
    %c0_i32 = arith.constant 0 : i32
    %c0_i32_0 = arith.constant 0 : i32
    %c0_i32_1 = arith.constant 0 : i32
    return %arg1, %c0_i32, %c0_i32_0 : i32, i32, i32
  }
  func.func @transform_7(%arg0: i32, %arg1: i32) -> (i32, i32, i32) {
    %c0_i32 = arith.constant 0 : i32
    %c0_i32_0 = arith.constant 0 : i32
    %c0_i32_1 = arith.constant 0 : i32
    return %arg1, %c0_i32, %c0_i32_0 : i32, i32, i32
  }
  func.func @transform_8(%arg0: i32, %arg1: i32) -> (i32, i32) {
    %c0_i32 = arith.constant 0 : i32
    %c0_i32_0 = arith.constant 0 : i32
    return %arg0, %c0_i32 : i32, i32
  }
}

</mosaic_0001>

<bundles_post_ra>
// kernel: mul.5
= control target key start
LH: loop header
LB: loop body
LE: loop exit
PB: predicated region body
PF: predicated region fallthrough
CT: control target
= control target key end

     0   :  { %vm8_vm0 = vcmask 523264   ;;  %s23_s8 = smov 64   ;;  %vm14_vm1 = vcmask 1048064   ;;  %s40_s0 = inlined_call_operand.vmem [shape: f32[3,64], index: 0, kind: input, shape index: {}]   ;;  %s41_s1 = inlined_call_operand.vmem [shape: f32[192], index: 1, kind: output, shape index: {}]  }
   0x1   :  { %v4_v0 = vld [vmem:[%s40_s0] sm:$0xf]  ;;  %s6_s0 = smov 3 }
   0x2   :  { %5 = vst [vmem:[#allocation1] sm:$0xf] %v4_v0 }
   0x9   :  { %v11_v1 = vld [vmem:[#allocation1 + $0x1] sm:$0x1]   ;;  %v7_v2 = vld [vmem:[#allocation1] ss:$2 sm:%s6_s0]  }
   0xa   :  { %12 = vrot.lane.b32.xlu0 %v11_v1, %s23_s8  ;;  %9 = vst.msk [vmem:[#allocation0] sm:$0x3] %vm8_vm0, %v7_v2  }
  0x7c   :  { %v13_v3 = vpop.permute.xlu0 %12  }
  0x7d   :  { %15 = vst.msk [vmem:[#allocation0] sm:$0x1] %vm14_vm1, %v13_v3  }
  0x84   :  { %v18_v4 = vld [vmem:[#allocation0] sm:$0x3] }
  0x85   :  { %21 = vst [vmem:[%s41_s1] sm:$0x3] %v18_v4 }

// kernel: flava_image_encoder.1
= control target key start
LH: loop header
LB: loop body
LE: loop exit
PB: predicated region body
PF: predicated region fallthrough
CT: control target
= control target key end

     0   :  { %13 = vsyncpa [#allocation5], 0  ;;  %s1995_s27 = smov 0   ;;  %s1997_s28 = smov 0   ;;  %s2371_s0 = inlined_call_operand.vmem [shape: f32[8,192], index: 0, kind: input, shape index: {}]   ;;  %s2372_s1 = inlined_call_operand.vmem [shape: f32[192,32], index: 1, kind: input, shape index: {}]   ;;  %s2373_s2 = inlined_call_operand.vmem [shape: f32[9,32], index: 2, kind: input, shape index: {}]   ;;  %s2374_s3 = inlined_call_operand.vmem [shape: bf16[2,32,96], index: 3, kind: input, shape index: {}]   ;;  %s2375_s4 = inlined_call_operand.vmem [shape: bf16[2,32,32], index: 4, kind: input, shape index: {}]   ;;  %s2376_s5 = inlined_call_operand.vmem [shape: bf16[2,32,128], index: 5, kind: input, shape index: {}]   ;;  %s2377_s6 = inlined_call_operand.vmem [shape: bf16[2,128,32], index: 6, kind: input, shape index: {}]   ;;  %s2378_s7 = inlined_call_operand.vmem [shape: f32[2,8,128], index: 7, kind: input, shape index: {}]   ;;  %s2379_s8 = inlined_call_operand.hbm [shape: f32[2,32], index: 8, kind: output, shape index: {}]  }
   0x1   :  { %s1999_s29 = smov 0  }
   0x2 LB: > { %s1658_s30 = sadd.s32 4294967295, %s1937_s29   ;;  %s28_s9 = sadd.s32 1, %s1933_s28  ;;  %s1937_s29 = sphi %s1999_s29, %s19_s29   ;;  %s1933_s28 = sphi %s1997_s28, %s2381_s28   ;;  %s1929_s27 = sphi %s1995_s27, %s2380_s27  }
   0x3   : > { %p29_p0 = scmp.ge.s32.totalorder %s28_s9, 2  ;;  %p1662_p1 = scmp.ge.s32.totalorder %s1937_s29, 1 }
   0x4   : > { %p324_p2 = scmp.lt.s32.totalorder %s1937_s29, 3 }
   0x5   : > { %s2383_s9 = smov (%p29_p0, %s28_s9), 0 }
   0x6   : > { %p325_p3 = pnand %p1662_p1, %p324_p2 }
   0x7   : > { %p382_p4 = scmp.lt.s32.totalorder (!%p325_p3), %s1929_s27, 1  ;;  %p1672_p5 = scmp.ne.s32.totalorder (!%p325_p3), %s1929_s27, 0 }
   0x8   : > { %328 = sbr.rel (%p325_p3) target bundleno = 2557 (0x9fd), region = 52 }
   0xd   : > { %v2020_v0 = vld [vmem:[%s2373_s2] sm:$0xff]  ;;  %v2025_v1 = vld [vmem:[%s2373_s2 + $0x8] sm:$0x1]  ;;  %s383_s14 = scalar_select %p382_p4, %s1929_s27, 1 }
   0xf   : > { %s1770_s15 = sshll.u32 %s383_s14, 4  ;;  %s1773_s16 = sshll.u32 %s383_s14, 6 }
  0x10   : > { %s2031_s19 = scalar_lea.vmem %s2374_s3, %s1770_s15  ;;  %s2036_s22 = scalar_lea.vmem %s2375_s4, %s1770_s15 }
  0x11   : > { %s2041_s25 = scalar_lea.vmem %s2376_s5, %s1770_s15  ;;  %s2046_s11 = scalar_lea.vmem %s2377_s6, %s1773_s16 }
  0x12   : > { %s1671_s12 = sshll.u32 %s383_s14, 3  ;;  %412 = sbr.rel (%p1672_p5) target bundleno = 189 (0xbd), region = 56 }
  0x13   : > { %s2051_s18 = scalar_lea.vmem %s2378_s7, %s1671_s12 }
  0x17   : > { %v430_v2 = vld [vmem:[%s2372_s1 + $0x78] sm:$0xff]  ;;  %v429_v3 = vld [vmem:[%s2372_s1 + $0x70] sm:$0xff]  ;;  %v428_v4 = vld [vmem:[%s2372_s1 + $0x68] sm:$0xff]  ;;  %vm440_vm0 = vcmask 523264   ;;  %v485_v28 = vrot.slane %v2020_v0, 3  ;;  %vm488_vm1 = vcmask 254977  }
  0x18   : > { %444 = vmatpush.msra.mxu0 %v430_v2  ;;  %v438_v5 = vld [vmem:[%s2372_s1 + $0xb8] sm:$0xff]  ;;  %v427_v6 = vld [vmem:[%s2372_s1 + $0x60] sm:$0xff]  ;;  %v437_v7 = vld [vmem:[%s2372_s1 + $0xb0] sm:$0xff]  ;;  %v439_v30 = vperm.slane %v2020_v0, 0  ;;  %v492_v31 = vrot.slane %v2020_v0, 5  ;;  %v493_v32 = vrot.slane %v2025_v1, 5 }
  0x19   : > { %472 = vmatpush.msra.mxu1 %v438_v5  ;;  %v436_v8 = vld [vmem:[%s2372_s1 + $0xa8] sm:$0xff]  ;;  %v426_v9 = vld [vmem:[%s2372_s1 + $0x58] sm:$0xff]  ;;  %v435_v10 = vld [vmem:[%s2372_s1 + $0xa0] sm:$0xff]  ;;  %v487_v29 = vadd.f32 %v485_v28, %v2020_v0  ;;  %v501_v33 = vrot.slane %v2020_v0, 1  ;;  %v502_v34 = vrot.slane %v2025_v1, 1  ;;  %vm491_vm2 = vcmask 1042432  }
  0x1a   : > { %445 = vmatpush.msra.mxu0 %v429_v3  ;;  %v425_v11 = vld [vmem:[%s2372_s1 + $0x50] sm:$0xff]  ;;  %v434_v12 = vld [vmem:[%s2372_s1 + $0x98] sm:$0xff]  ;;  %v424_v13 = vld [vmem:[%s2372_s1 + $0x48] sm:$0xff]  ;;  %vm500_vm3 = vcmask 1046528   ;;  %v494_v38 = vsel %vm491_vm2, %v492_v31, %v493_v32  ;;  %vm497_vm4 = vcmask 257024   ;;  %vm506_vm5 = vcmask 261124  }
  0x1b   : > { %473 = vmatpush.msra.mxu1 %v437_v7  ;;  %v433_v14 = vld [vmem:[%s2372_s1 + $0x90] sm:$0xff]  ;;  %v423_v15 = vld [vmem:[%s2372_s1 + $0x40] sm:$0xff]  ;;  %v432_v16 = vld [vmem:[%s2372_s1 + $0x88] sm:$0xff]  ;;  %489 = vst.msk [vmem:[#allocation2 - $0x1] sm:$0x2] %vm488_vm1, %v487_v29  ;;  %v503_v39 = vsel %vm500_vm3, %v501_v33, %v502_v34 }
  0x1c   : > { %446 = vmatpush.msra.mxu0 %v428_v4  ;;  %v422_v17 = vld [vmem:[%s2372_s1 + $0x38] sm:$0xff]  ;;  %v431_v18 = vld [vmem:[%s2372_s1 + $0x80] sm:$0xff]  ;;  %v421_v19 = vld [vmem:[%s2372_s1 + $0x30] sm:$0xff]  ;;  %499 = vst.msk [vmem:[#allocation2 + $0x4] sm:$0x2] %vm488_vm1, %v487_v29 }
  0x1d   : > { %474 = vmatpush.msra.mxu1 %v436_v8  ;;  %v414_v20 = vld [vmem:[%s2371_s0 + $0x8] sm:$0xff]  ;;  %v419_v22 = vld [vmem:[%s2372_s1 + $0x20] sm:$0xff]  ;;  %v418_v23 = vld [vmem:[%s2372_s1 + $0x18] sm:$0xff] }
  0x1e   : > { %447 = vmatpush.msra.mxu0 %v427_v6  ;;  %v420_v21 = vld [vmem:[%s2372_s1 + $0x28] sm:$0xff]  ;;  %v417_v24 = vld [vmem:[%s2372_s1 + $0x10] sm:$0xff]  ;;  %v415_v26 = vld [vmem:[%s2372_s1] sm:$0xff] }
  0x1f   : > { %475 = vmatpush.msra.mxu1 %v435_v10  ;;  %v416_v25 = vld [vmem:[%s2372_s1 + $0x8] sm:$0xff]  ;;  %v413_v27 = vld [vmem:[%s2371_s0] sm:$0xff] }
  0x20   : > { %448 = vmatpush.msra.mxu0 %v426_v9 }
  0x21   : > { %476 = vmatpush.msra.mxu1 %v434_v12 }
  0x22   : > { %449 = vmatpush.msra.mxu0 %v425_v11 }
  0x23   : > { %477 = vmatpush.msra.mxu1 %v433_v14 }
  0x24   : > { %450 = vmatpush.msra.mxu0 %v424_v13 }
  0x25   : > { %478 = vmatpush.msra.mxu1 %v432_v16 }
  0x26   : > { %451 = vmatpush.msra.mxu0 %v423_v15 }
  0x27   : > { %479 = vmatpush.msra.mxu1 %v431_v18 }
  0x28   : > { %452 = vmatpush.msra.mxu0 %v422_v17  ;;  %1673 = vmatmul.msk.f32.vlgmr.msra.gmra.mxu1 %vm440_vm0, %v414_v20 }
  0x2a   : > { %453 = vmatpush.msra.mxu0 %v421_v19 }
  0x2c   : > { %454 = vmatpush.msra.mxu0 %v420_v21 }
  0x2e   : > { %455 = vmatpush.msra.mxu0 %v419_v22 }
  0x30   : > { %456 = vmatpush.msra.mxu0 %v418_v23 }
  0x32   : > { %457 = vmatpush.msra.mxu0 %v417_v24 }
  0x34   : > { %458 = vmatpush.msra.mxu0 %v416_v25 }
  0x36   : > { %459 = vmatpush.msra.mxu0 %v415_v26 }
  0x37   : > { %460 = vmatmul.f32.vlgmr.msra.gmra.mxu0 %v413_v27 }
  0xa5   : > { %v481_v36 = vpop.f32.mrf.mxu1 }
  0xb4   : > { %v461_v35 = vpop.f32.mrf.mxu0 }
  0xb5   : > { %v462_v37 = vadd.f32 %v461_v35, %v439_v30 }
  0xb7   : > { %v482_v40 = vadd.f32 %v481_v36, %v462_v37 }
  0xb9   : > { %v496_v41 = vadd.f32 %v494_v38, %v482_v40  ;;  %v505_v42 = vadd.f32 %v503_v39, %v482_v40 }
  0xbb   : > { %498 = vst.msk [vmem:[#allocation2 + $0x1] sm:$0xf] %vm497_vm4, %v496_v41 }
  0xbc   : > { %507 = vst.msk [vmem:[#allocation2 + $0x2] sm:$0xf0] %vm506_vm5, %v505_v42 }
  0xbd PF: > { %vm511_vm6 = vcmask 261120   ;;  %vm515_vm7 = vcmask 254976   ;;  %v1939_v47 = vmov 32.0   ;;  %v1775_v1 = vld [vmem:[%s2031_s19 + $0x8] sm:$0xff]  ;;  %v1774_v3 = vld [vmem:[%s2031_s19] sm:$0xff]  ;;  %s1940_s19 = smov 112  }
  0xbe   : > { %1829 = vrcp.f32 %v1939_v47  ;;  %597 = vmatpush.bf16.msra.mxu0 %v1775_v1  ;;  %v2160_v20 = vld [vmem:[%s2051_s18] sm:$0xff]  ;;  %s1941_s18 = smov 120   ;;  %vm613_vm15 = vcmask 1042432   ;;  %s1942_s16 = smov 104   ;;  %vm625_vm0 = vcmask 64512   ;;  %vm840_vm1 = vcmask 36864  }
  0xbf   : > { %v564_v23 = vperm.slane %v2160_v20, 0  ;;  %v567_v28 = vperm.slane %v2160_v20, 1  ;;  %v575_v33 = vperm.slane %v2160_v20, 2  ;;  %s1943_s24 = smov 96   ;;  %s1944_s14 = smov 64   ;;  %vm935_vm2 = vcmask 1044480  }
  0xc0   : > { %vm931_vm3 = vcmask 39936   ;;  %s1945_s26 = smov 8   ;;  %s1946_s10 = smov 16   ;;  %vm1147_vm4 = vcmask 61440   ;;  %vm1153_vm5 = vcmask 127040  }
  0xc1   : > { %s1947_s12 = smov 24   ;;  %p1765_p6 = scmp.ne.s32.totalorder %s1929_s27, 1 }
  0xc2   : > { %598 = vmatpush.bf16.msra.mxu0 %v1774_v3 }
  0xc3   : > { %v2139_v43 = vld [vmem:[#allocation2] sm:$0xff]  ;;  %v2143_v45 = vld [vmem:[#allocation2 + $0x8] sm:$0x3] }
  0xc4   : > { %v512_v44 = vsel %vm511_vm6, %v2139_v43, 0.0  ;;  %v516_v46 = vsel %vm515_vm7, %v2143_v45, 0.0  ;;  %v1830_v48 = vpop.eup %1829 }
  0xc5   : > { %513 = vadd.xlane.f32.xlu0 %v512_v44  ;;  %v520_v49 = vmul.f32 32.0, %v1830_v48  ;;  %vm524_vm8 = vweird.f32 %v1830_v48 }
  0xc7   : > { %v521_v50 = vsub.f32 1.0, %v520_v49 }
  0xc9   : > { %v522_v51 = vmul.f32 %v1830_v48, %v521_v50 }
  0xcb   : > { %v523_v52 = vadd.f32 %v1830_v48, %v522_v51 }
  0xcd   : > { %517 = vadd.xlane.f32.xlu0 %v516_v46  ;;  %v2147_v53 = vsel %vm524_vm8, %v1830_v48, %v523_v52  ;;  %vm1159_vm8 = vcmask 192640  }
 0x138   : > { %v514_v54 = vpop.xlane.xlu0 %513 }
 0x139   : > { %v526_v55 = vmul.f32 %v2147_v53, %v514_v54 }
 0x13b   : > { %v528_v56 = vsub.f32 %v2139_v43, %v526_v55 }
 0x13d   : > { %v530_v57 = vmul.f32 %v528_v56, %v528_v56 }
 0x13f   : > { %v532_v58 = vsel %vm511_vm6, %v530_v57, 0.0 }
 0x140   : > { %533 = vadd.xlane.f32.xlu1 %v532_v58  ;;  %v518_v59 = vpop.xlane.xlu0 %517 }
 0x141   : > { %v527_v60 = vmul.f32 %v2147_v53, %v518_v59 }
 0x143   : > { %v529_v61 = vsub.f32 %v2143_v45, %v527_v60 }
 0x145   : > { %v531_v62 = vmul.f32 %v529_v61, %v529_v61 }
 0x147   : > { %v535_v63 = vsel %vm515_vm7, %v531_v62, 0.0 }
 0x148   : > { %536 = vadd.xlane.f32.xlu1 %v535_v63 }
 0x1b3   : > { %v534_v2 = vpop.xlane.xlu1 %533 }
 0x1b4   : > { %v538_v4 = vmul.f32 %v534_v2, %v2147_v53 }
 0x1b6   : > { %v540_v5 = vadd.f32 1e-12, %v538_v4 }
 0x1b8   : > { %1831 = vrsqrt.f32 %v540_v5  ;;  %vm548_vm10 = vweird.f32 %v540_v5 }
 0x1bb   : > { %v537_v6 = vpop.xlane.xlu1 %536 }
 0x1bc   : > { %v539_v7 = vmul.f32 %v537_v6, %v2147_v53 }
 0x1be   : > { %v1832_v8 = vpop.eup %1831  ;;  %v541_v9 = vadd.f32 1e-12, %v539_v7 }
 0x1bf   : > { %v543_v10 = vmul.f32 %v1832_v8, %v540_v5  ;;  %vm549_vm9 = vweird.f32 %v1832_v8 }
 0x1c0   : > { %1833 = vrsqrt.f32 %v541_v9  ;;  %vm550_vm11 = vmor %vm548_vm10, %vm549_vm9  ;;  %vm558_vm13 = vweird.f32 %v541_v9  ;;  %vm1165_vm9 = vcmask 258240  }
 0x1c1   : > { %v544_v11 = vmul.f32 %v1832_v8, %v543_v10 }
 0x1c3   : > { %v545_v12 = vmul.f32 0.5, %v544_v11 }
 0x1c5   : > { %v546_v13 = vsub.f32 1.5, %v545_v12 }
 0x1c6   : > { %v1834_v14 = vpop.eup %1833 }
 0x1c7   : > { %v547_v15 = vmul.f32 %v1832_v8, %v546_v13  ;;  %v553_v16 = vmul.f32 %v1834_v14, %v541_v9  ;;  %vm559_vm12 = vweird.f32 %v1834_v14 }
 0x1c8   : > { %vm560_vm14 = vmor %vm558_vm13, %vm559_vm12 }
 0x1c9   : > { %v554_v17 = vmul.f32 %v1834_v14, %v553_v16  ;;  %v551_v18 = vsel %vm550_vm11, %v1832_v8, %v547_v15 }
 0x1ca   : > { %v562_v22 = vmul.f32 %v551_v18, %v528_v56 }
 0x1cb   : > { %v555_v19 = vmul.f32 0.5, %v554_v17 }
 0x1cc   : > { %v565_v27 = vmul.f32 %v564_v23, %v562_v22 }
 0x1cd   : > { %v556_v21 = vsub.f32 1.5, %v555_v19 }
 0x1ce   : > { %v568_v30 = vadd.f32 %v567_v28, %v565_v27 }
 0x1cf   : > { %v557_v24 = vmul.f32 %v1834_v14, %v556_v21 }
 0x1d1   : > { %v561_v25 = vsel %vm560_vm14, %v1834_v14, %v557_v24 }
 0x1d2   : > { %v563_v26 = vmul.f32 %v561_v25, %v529_v61 }
 0x1d4   : > { %v566_v29 = vmul.f32 %v564_v23, %v563_v26 }
 0x1d6   : > { %v569_v31 = vadd.f32 %v567_v28, %v566_v29 }
 0x1d8   : > { %v570_v32 = vpack.c.bf16 %v569_v31, %v568_v30 }
 0x1da   : > { %1682 = vmatmul.msk.bf16.vlgmr.msra.gmra.mxu0 %vm511_vm6, %v570_v32 }
 0x257   : > { %v600_v34 = vpop.f32.mrf.mxu0 }
 0x258   : > { %v2166_v35 = vadd.f32 %v600_v34, %v575_v33 }
 0x25a   : > { %608 = vrot.lane.b32.xlu0 %v2166_v35, %s1940_s19  ;;  %606 = vrot.lane.b32.xlu2 %v2166_v35, %s1941_s18  ;;  %v614_v38 = vrot.slane %v2166_v35, 5 }
 0x25f   : > { %v602_v36 = vpop.f32.mrf.mxu0 }
 0x260   : > { %v603_v37 = vadd.f32 %v602_v36, %v575_v33 }
 0x262   : > { %v615_v39 = vrot.slane %v603_v37, 5  ;;  %610 = vrot.lane.b32.xlu2 %v2166_v35, %s1942_s16 }
 0x264   : > { %v2172_v40 = vsel %vm613_vm15, %v614_v38, %v615_v39 }
 0x265   : > { %617 = vrot.lane.b32.xlu1 %v2172_v40, %s1941_s18 }
 0x26a   : > { %621 = vrot.lane.b32.xlu2 %v2172_v40, %s1942_s16 }
 0x272   : > { %619 = vrot.lane.b32.xlu2 %v2172_v40, %s1940_s19 }
 0x27a   : > { %623 = vrot.lane.b32.xlu2 %v2166_v35, %s1943_s24 }
 0x2b4   : > { %v2178_v41 = vpop.permute.xlu2 %606 }
 0x2b5   : > { %650 = vrot.lane.b32.xlu0 %v2178_v41, %s1943_s24 }
 0x2bc   : > { %v2181_v42 = vpop.permute.xlu2 %610 }
 0x2bd   : > { %728 = vrot.lane.b32.xlu0 %v2172_v40, %s1943_s24  ;;  %702 = vrot.lane.b32.xlu2 %v2181_v42, %s1943_s24 }
 0x2c4   : > { %v2185_v44 = vpop.permute.xlu2 %621 }
 0x2cc   : > { %v2187_v46 = vpop.permute.xlu0 %608  ;;  %v2189_v47 = vpop.permute.xlu2 %619 }
 0x2cd   : > { %780 = vrot.lane.b32.xlu0 %v2189_v47, %s1943_s24  ;;  %676 = vrot.lane.b32.xlu1 %v2187_v46, %s1943_s24 }
 0x2d4   : > { %v624_v48 = vpop.permute.xlu2 %623 }
 0x2d5   : > { %1683 = vmatpush.xpose.msk.msra.mxu2 %vm625_vm0, %v624_v48  ;;  %806 = vrot.lane.b32.xlu1 %v2185_v44, %s1943_s24 }
 0x2d7   : > { %v2195_v49 = vpop.permute.xlu1 %617 }
 0x2d8   : > { %1684 = vmatmul.msk.f32.vlgmr.msra.gmra.mxu2 %vm625_vm0, %v2166_v35  ;;  %754 = vrot.lane.b32.xlu2 %v2195_v49, %s1943_s24 }
 0x317   : > { %v703_v51 = vpop.permute.xlu2 %702 }
 0x327   : > { %v651_v50 = vpop.permute.xlu0 %650 }
 0x328   : > { %1685 = vmatpush.xpose.msk.msrb.mxu2 %vm625_vm0, %v651_v50 }
 0x32b   : > { %1686 = vmatmul.msk.f32.vlgmr.msrb.gmra.mxu2 %vm625_vm0, %v2178_v41 }
 0x32c   : > { %1689 = vmatpush.xpose.msk.msra.mxu2 %vm625_vm0, %v703_v51 }
 0x32f   : > { %v729_v52 = vpop.permute.xlu0 %728 }
 0x330   : > { %1691 = vmatpush.xpose.msk.msrb.mxu2 %vm625_vm0, %v729_v52 }
 0x332   : > { %v755_v55 = vpop.permute.xlu2 %754 }
 0x333   : > { %1690 = vmatmul.msk.f32.vlgmr.msra.gmra.mxu2 %vm625_vm0, %v2181_v42 }
 0x33b   : > { %1692 = vmatmul.msk.f32.vlgmr.msrb.gmra.mxu2 %vm625_vm0, %v2172_v40 }
 0x33f   : > { %v677_v54 = vpop.permute.xlu1 %676  ;;  %v781_v56 = vpop.permute.xlu0 %780 }
 0x340   : > { %1687 = vmatpush.xpose.msk.msra.mxu3 %vm625_vm0, %v677_v54 }
 0x343   : > { %1688 = vmatmul.msk.f32.vlgmr.msra.gmra.mxu3 %vm625_vm0, %v2187_v46 }
 0x344   : > { %1693 = vmatpush.xpose.msk.msrb.mxu3 %vm625_vm0, %v755_v55 }
 0x347   : > { %v807_v57 = vpop.permute.xlu1 %806 }
 0x348   : > { %1695 = vmatpush.xpose.msk.msra.mxu3 %vm625_vm0, %v781_v56  ;;  %1697 = vmatpush.xpose.msk.msra.mxu2 %vm625_vm0, %v807_v57 }
 0x34b   : > { %1694 = vmatmul.msk.f32.vlgmr.msrb.gmra.mxu3 %vm625_vm0, %v2195_v49  ;;  %1698 = vmatmul.msk.f32.vlgmr.msra.gmra.mxu2 %vm625_vm0, %v2185_v44 }
 0x353   : > { %1696 = vmatmul.msk.f32.vlgmr.msra.gmra.mxu3 %vm625_vm0, %v2189_v47 }
 0x35b   : > { %v647_v58 = vpop.f32.mrf.mxu2 }
 0x35c   : > { %v2221_v59 = vmul.f32 0.35355338, %v647_v58 }
 0x35e   : > { %v841_v60 = vsel %vm840_vm1, %v2221_v59, -inf }
 0x35f   : > { %842 = vmax.xlane.f32.xlu2 %v841_v60 }
 0x3ae   : > { %v673_v61 = vpop.f32.mrf.mxu2 }
 0x3af   : > { %v833_v62 = vmul.f32 0.35355338, %v673_v61 }
 0x3b1   : > { %v844_v63 = vsel %vm840_vm1, %v833_v62, -inf }
 0x3b2   : > { %845 = vmax.xlane.f32.xlu1 %v844_v63 }
 0x3b6   : > { %v725_v1 = vpop.f32.mrf.mxu2 }
 0x3b7   : > { %v835_v2 = vmul.f32 0.35355338, %v725_v1 }
 0x3b9   : > { %v850_v3 = vsel %vm840_vm1, %v835_v2, -inf }
 0x3ba   : > { %851 = vmax.xlane.f32.xlu2 %v850_v3 }
 0x3be   : > { %v751_v4 = vpop.f32.mrf.mxu2 }
 0x3bf   : > { %v836_v14 = vmul.f32 0.35355338, %v751_v4 }
 0x3c1   : > { %v853_v17 = vsel %vm840_vm1, %v836_v14, -inf }
 0x3c6   : > { %v699_v5 = vpop.f32.mrf.mxu3 }
 0x3c7   : > { %v834_v6 = vmul.f32 0.35355338, %v699_v5 }
 0x3c9   : > { %v847_v7 = vsel %vm840_vm1, %v834_v6, -inf }
 0x3ca   : > { %848 = vmax.xlane.f32.xlu0 %v847_v7 }
 0x3ce   : > { %v777_v8 = vpop.f32.mrf.mxu3  ;;  %v829_v9 = vpop.f32.mrf.mxu2 }
 0x3cf   : > { %v837_v10 = vmul.f32 0.35355338, %v777_v8  ;;  %v839_v11 = vmul.f32 0.35355338, %v829_v9 }
 0x3d1   : > { %v856_v12 = vsel %vm840_vm1, %v837_v10, -inf  ;;  %v862_v13 = vsel %vm840_vm1, %v839_v11, -inf }
 0x3d2   : > { %857 = vmax.xlane.f32.xlu1 %v856_v12  ;;  %863 = vmax.xlane.f32.xlu2 %v862_v13  ;;  %v843_v19 = vpop.xlane.xlu2 %842 }
 0x3d6   : > { %v803_v15 = vpop.f32.mrf.mxu3 }
 0x3d7   : > { %v838_v16 = vmul.f32 0.35355338, %v803_v15 }
 0x3d9   : > { %v859_v18 = vsel %vm840_vm1, %v838_v16, -inf }
 0x3da   : > { %854 = vmax.xlane.f32.xlu1 %v853_v17  ;;  %860 = vmax.xlane.f32.xlu0 %v859_v18 }
 0x3ea   : > { %1012 = vrot.lane.b32.xlu2 %v2181_v42, %s1944_s14 }
 0x425   : > { %v846_v21 = vpop.xlane.xlu1 %845 }
 0x426   : > { %v866_v22 = vsub.f32 %v833_v62, %v846_v21 }
 0x428   : > { %v875_v23 = vmul.f32 1.442695, %v866_v22 }
 0x42a   : > { %1835 = vpow2.f32 %v875_v23 }
 0x42d   : > { %v852_v24 = vpop.xlane.xlu2 %851 }
 0x42e   : > { %v868_v25 = vsub.f32 %v835_v2, %v852_v24 }
 0x430   : > { %v2234_v26 = vpop.eup %1835  ;;  %v879_v27 = vmul.f32 1.442695, %v868_v25 }
 0x431   : > { %v892_v28 = vsel %vm840_vm1, %v2234_v26, 0.0 }
 0x432   : > { %1837 = vpow2.f32 %v879_v27  ;;  %893 = vadd.xlane.f32.xlu2 %v892_v28 }
 0x438   : > { %v1838_v29 = vpop.eup %1837 }
 0x439   : > { %v898_v30 = vsel %vm840_vm1, %v1838_v29, 0.0 }
 0x43a   : > { %899 = vadd.xlane.f32.xlu0 %v898_v30 }
 0x43d   : > { %v849_v31 = vpop.xlane.xlu0 %848 }
 0x43e   : > { %v867_v32 = vsub.f32 %v834_v6, %v849_v31 }
 0x440   : > { %v877_v33 = vmul.f32 1.442695, %v867_v32 }
 0x442   : > { %1839 = vpow2.f32 %v877_v33 }
 0x445   : > { %v864_v34 = vpop.xlane.xlu2 %863  ;;  %v858_v36 = vpop.xlane.xlu1 %857 }
 0x446   : > { %v870_v37 = vsub.f32 %v837_v10, %v858_v36  ;;  %v872_v57 = vsub.f32 %v839_v11, %v864_v34 }
 0x448   : > { %v1840_v38 = vpop.eup %1839  ;;  %v883_v39 = vmul.f32 1.442695, %v870_v37  ;;  %v887_v58 = vmul.f32 1.442695, %v872_v57 }
 0x449   : > { %v895_v42 = vsel %vm840_vm1, %v1840_v38, 0.0 }
 0x44a   : > { %896 = vadd.xlane.f32.xlu1 %v895_v42  ;;  %1120 = vrot.lane.b32.xlu2 %v2185_v44, %s1944_s14  ;;  %1841 = vpow2.f32 %v883_v39 }
 0x44d   : > { %v1013_v48 = vpop.permute.xlu2 %1012  ;;  %v855_v44 = vpop.xlane.xlu1 %854 }
 0x44e   : > { %985 = vrot.lane.b32.xlu0 %v2187_v46, %s1944_s14  ;;  %1705 = vmatpush.msk.msrb.mxu2 %vm935_vm2, %v1013_v48  ;;  %v869_v52 = vsub.f32 %v836_v14, %v855_v44  ;;  %v861_v54 = vpop.xlane.xlu0 %860  ;;  %v1776_v44 = vld [vmem:[%s2036_s22] sm:$0xff] }
 0x44f   : > { %v871_v55 = vsub.f32 %v838_v16, %v861_v54 }
 0x450   : > { %v2245_v50 = vpop.eup %1841  ;;  %v881_v46 = vmul.f32 1.442695, %v869_v52 }
 0x451   : > { %v904_v51 = vsel %vm840_vm1, %v2245_v50, 0.0  ;;  %v885_v56 = vmul.f32 1.442695, %v871_v55 }
 0x452   : > { %1066 = vrot.lane.b32.xlu2 %v2195_v49, %s1944_s14  ;;  %905 = vadd.xlane.f32.xlu1 %v904_v51  ;;  %1843 = vpow2.f32 %v881_v46 }
 0x453   : > { %1845 = vpow2.f32 %v885_v56 }
 0x454   : > { %1847 = vpow2.f32 %v887_v58 }
 0x456   : > { %1093 = vrot.lane.b32.xlu0 %v2189_v47, %s1944_s14 }
 0x458   : > { %v2255_v49 = vpop.eup %1843 }
 0x459   : > { %v901_v60 = vsel %vm840_vm1, %v2255_v49, 0.0  ;;  %v1846_v47 = vpop.eup %1845 }
 0x45a   : > { %v907_v61 = vsel %vm840_vm1, %v1846_v47, 0.0  ;;  %v1848_v62 = vpop.eup %1847 }
 0x45b   : > { %v910_v63 = vsel %vm840_vm1, %v1848_v62, 0.0 }
 0x46b   : > { %958 = vrot.lane.b32.xlu1 %v2178_v41, %s1944_s14  ;;  %v865_v41 = vsub.f32 %v2221_v59, %v843_v19 }
 0x46d   : > { %v873_v1 = vmul.f32 1.442695, %v865_v41 }
 0x46f   : > { %1849 = vpow2.f32 %v873_v1 }
 0x475   : > { %v1850_v2 = vpop.eup %1849 }
 0x476   : > { %v889_v3 = vsel %vm840_vm1, %v1850_v2, 0.0 }
 0x47b   : > { %902 = vadd.xlane.f32.xlu2 %v901_v60  ;;  %v1190_v60 = vperm.slane %v2160_v20, 3 }
 0x480   : > { %908 = vadd.xlane.f32.xlu0 %v907_v61 }
 0x488   : > { %911 = vadd.xlane.f32.xlu0 %v910_v63 }
 0x495   : > { %890 = vadd.xlane.f32.xlu1 %v889_v3 }
 0x49c   : > { %929 = vrot.lane.b32.xlu0 %v2166_v35, %s1944_s14 }
 0x4a4   : > { %1039 = vrot.lane.b32.xlu0 %v2172_v40, %s1944_s14 }
 0x4a5   : > { %v894_v4 = vpop.xlane.xlu2 %893 }
 0x4ad   : > { %v900_v5 = vpop.xlane.xlu0 %899  ;;  %v1121_v6 = vpop.permute.xlu2 %1120 }
 0x4ae   : > { %1851 = vrcp.f32 %v900_v5  ;;  %1713 = vmatpush.msk.msra.mxu2 %vm935_vm2, %v1121_v6 }
 0x4b4   : > { %v1852_v59 = vpop.eup %1851 }
 0x4b5   : > { %v924_v7 = vmul.f32 %v1852_v59, %v1838_v29  ;;  %v1067_v15 = vpop.permute.xlu2 %1066 }
 0x4b7   : > { %1706 = vmatmul.msk.f32.vlgmr.msrb.gmra.mxu2 %vm931_vm3, %v924_v7 }
 0x4bd   : > { %v897_v8 = vpop.xlane.xlu1 %896 }
 0x4be   : > { %1853 = vrcp.f32 %v897_v8 }
 0x4bf   : > { %1855 = vrcp.f32 %v894_v4 }
 0x4c0   : > { %v986_v9 = vpop.permute.xlu0 %985 }
 0x4c1   : > { %1703 = vmatpush.msk.msra.mxu1 %vm935_vm2, %v986_v9 }
 0x4c4   : > { %v1854_v35 = vpop.eup %1853 }
 0x4c5   : > { %v923_v10 = vmul.f32 %v1854_v35, %v1840_v38  ;;  %v906_v11 = vpop.xlane.xlu1 %905  ;;  %v1856_v12 = vpop.eup %1855 }
 0x4c6   : > { %1857 = vrcp.f32 %v906_v11  ;;  %v922_v14 = vmul.f32 %v1856_v12, %v2234_v26 }
 0x4c7   : > { %1704 = vmatmul.msk.f32.vlgmr.msra.gmra.mxu1 %vm931_vm3, %v923_v10 }
 0x4c8   : > { %v1094_v40 = vpop.permute.xlu0 %1093 }
 0x4c9   : > { %1711 = vmatpush.msk.msrb.mxu1 %vm935_vm2, %v1094_v40  ;;  %v1779_v40 = vld [vmem:[%s2041_s25 + $0x8] sm:$0xff] }
 0x4cc   : > { %v1858_v16 = vpop.eup %1857 }
 0x4cd   : > { %v926_v17 = vmul.f32 %v1858_v16, %v2245_v50  ;;  %v1777_v50 = vld [vmem:[%s2036_s22 + $0x8] sm:$0xff] }
 0x4dd   : > { %v959_v13 = vpop.permute.xlu1 %958 }
 0x4de   : > { %1701 = vmatpush.msk.msrb.mxu0 %vm935_vm2, %v959_v13  ;;  %v1778_v13 = vld [vmem:[%s2041_s25] sm:$0xff] }
 0x4df   : > { %1702 = vmatmul.msk.f32.vlgmr.msrb.gmra.mxu0 %vm931_vm3, %v922_v14 }
 0x4e0   : > { %1709 = vmatpush.msk.msra.mxu0 %vm935_vm2, %v1067_v15 }
 0x4e2   : > { %1299 = vmatpush.bf16.msrb.mxu0 %v1779_v40 }
 0x4e6   : > { %1300 = vmatpush.bf16.msrb.mxu0 %v1778_v13 }
 0x4e7   : > { %1710 = vmatmul.msk.f32.vlgmr.msra.gmra.mxu0 %vm931_vm3, %v926_v17 }
 0x4ee   : > { %v903_v26 = vpop.xlane.xlu2 %902 }
 0x4f3   : > { %v909_v18 = vpop.xlane.xlu0 %908 }
 0x4f4   : > { %1859 = vrcp.f32 %v909_v18 }
 0x4fa   : > { %v1860_v19 = vpop.eup %1859 }
 0x4fb   : > { %v912_v21 = vpop.xlane.xlu0 %911  ;;  %v927_v22 = vmul.f32 %v1860_v19, %v1846_v47 }
 0x4fc   : > { %1861 = vrcp.f32 %v912_v21 }
 0x4fd   : > { %1712 = vmatmul.msk.f32.vlgmr.msrb.gmra.mxu1 %vm931_vm3, %v927_v22 }
 0x502   : > { %v1862_v23 = vpop.eup %1861 }
 0x503   : > { %v928_v24 = vmul.f32 %v1862_v23, %v1848_v62 }
 0x505   : > { %1714 = vmatmul.msk.f32.vlgmr.msra.gmra.mxu2 %vm931_vm3, %v928_v24 }
 0x508   : > { %v891_v25 = vpop.xlane.xlu1 %890 }
 0x509   : > { %1863 = vrcp.f32 %v891_v25 }
 0x50a   : > { %1865 = vrcp.f32 %v903_v26 }
 0x50e   : > { %v930_v27 = vpop.permute.xlu0 %929 }
 0x50f   : > { %1699 = vmatpush.msk.msrb.mxu3 %vm935_vm2, %v930_v27  ;;  %v1864_v28 = vpop.eup %1863 }
 0x510   : > { %v921_v29 = vmul.f32 %v1864_v28, %v1850_v2  ;;  %v1866_v30 = vpop.eup %1865 }
 0x511   : > { %v925_v32 = vmul.f32 %v1866_v30, %v2255_v49  ;;  %v1266_v30 = vperm.slane %v2160_v20, 4 }
 0x512   : > { %1700 = vmatmul.msk.f32.vlgmr.msrb.gmra.mxu3 %vm931_vm3, %v921_v29 }
 0x516   : > { %v1040_v31 = vpop.permute.xlu0 %1039 }
 0x517   : > { %1707 = vmatpush.msk.msra.mxu3 %vm935_vm2, %v1040_v31 }
 0x519   : > { %1212 = vmatpush.bf16.msrb.mxu3 %v1777_v50  ;;  %v1277_v50 = vperm.slane %v2160_v20, 6 }
 0x51a   : > { %1708 = vmatmul.msk.f32.vlgmr.msra.gmra.mxu3 %vm931_vm3, %v925_v32 }
 0x51d   : > { %1213 = vmatpush.bf16.msrb.mxu3 %v1776_v44 }
 0x53a   : > { %v1036_v37 = vpop.f32.mrf.mxu2 }
 0x544   : > { %v1009_v34 = vpop.f32.mrf.mxu1 }
 0x55c   : > { %v982_v33 = vpop.f32.mrf.mxu0 }
 0x55d   : > { %1150 = vrot.lane.b32.xlu0 %v982_v33, %s1945_s26 }
 0x564   : > { %v1090_v36 = vpop.f32.mrf.mxu0 }
 0x565   : > { %1156 = vrot.lane.b32.xlu0 %v1009_v34, %s1946_s10  ;;  %v1269_v34 = vperm.slane %v2160_v20, 5 }
 0x56d   : > { %1169 = vrot.lane.b32.xlu0 %v1090_v36, %s1945_s26 }
 0x575   : > { %1162 = vrot.lane.b32.xlu0 %v1036_v37, %s1947_s12 }
 0x57a   : > { %v1117_v38 = vpop.f32.mrf.mxu1 }
 0x57b   : > { %1174 = vrot.lane.b32.xlu1 %v1117_v38, %s1946_s10 }
 0x588   : > { %v1144_v39 = vpop.f32.mrf.mxu2 }
 0x589   : > { %1179 = vrot.lane.b32.xlu2 %v1144_v39, %s1947_s12 }
 0x595   : > { %v955_v42 = vpop.f32.mrf.mxu3 }
 0x596   : > { %1148 = vst.msk [vmem:[#allocation3] sm:$0x1f] %vm1147_vm4, %v955_v42 }
 0x59d   : > { %v1063_v48 = vpop.f32.mrf.mxu3 }
 0x59e   : > { %1167 = vst.msk [vmem:[#allocation3 + $0x5] sm:$0x1f] %vm1147_vm4, %v1063_v48 }
 0x5cf   : > { %v1151_v51 = vpop.permute.xlu0 %1150 }
 0x5d0   : > { %1154 = vst.msk [vmem:[#allocation3] sm:$0x1f] %vm1153_vm5, %v1151_v51 }
 0x5d7   : > { %v1157_v52 = vpop.permute.xlu0 %1156 }
 0x5d8   : > { %1160 = vst.msk [vmem:[#allocation3] sm:$0x1f] %vm1159_vm8, %v1157_v52 }
 0x5df   : > { %v1170_v54 = vpop.permute.xlu0 %1169 }
 0x5e0   : > { %1172 = vst.msk [vmem:[#allocation3 + $0x5] sm:$0x1f] %vm1153_vm5, %v1170_v54  ;;  %v1787_v54 = vld [vmem:[%s2046_s11 + $0x38] sm:$0xff] }
 0x5e1   : > { %1451 = vmatpush.bf16.msra.mxu1 %v1787_v54 }
 0x5e3   : > { %v1180_v56 = vpop.permute.xlu2 %1179 }
 0x5e7   : > { %v1163_v46 = vpop.permute.xlu0 %1162 }
 0x5e8   : > { %1166 = vst.msk [vmem:[#allocation3] sm:$0x1f] %vm1165_vm9, %v1163_v46 }
 0x5ed   : > { %v1175_v55 = vpop.permute.xlu1 %1174 }
 0x5ee   : > { %1177 = vst.msk [vmem:[#allocation3 + $0x5] sm:$0x1f] %vm1159_vm8, %v1175_v55 }
 0x5ef   : > { %1182 = vst.msk [vmem:[#allocation3 + $0x5] sm:$0x1f] %vm1165_vm9, %v1180_v56  ;;  %v1786_v56 = vld [vmem:[%s2046_s11 + $0x30] sm:$0xff] }
 0x5f0   : > { %1452 = vmatpush.bf16.msra.mxu1 %v1786_v56 }
 0x5f6   : > { %v1183_v57 = vld [vmem:[#allocation3] sm:$0xff]  ;;  %v1184_v49 = vld [vmem:[#allocation3 + $0x8] sm:$0x3] }
 0x5f7   : > { %v1185_v58 = vpack.c.bf16 %v1184_v49, %v1183_v57 }
 0x5f9   : > { %1723 = vmatmul.msk.bf16.vlgmr.msrb.gmra.mxu3 %vm511_vm6, %v1185_v58 }
 0x67c   : > { %v1215_v47 = vpop.f32.mrf.mxu3 }
 0x67d   : > { %v1216_v61 = vadd.f32 %v1215_v47, %v1190_v60 }
 0x67f   : > { %v2290_v62 = vadd.f32 %v1216_v61, %v2139_v43 }
 0x681   : > { %v1222_v41 = vsel %vm511_vm6, %v2290_v62, 0.0 }
 0x682   : > { %1223 = vadd.xlane.f32.xlu0 %v1222_v41  ;;  %v1784_v41 = vld [vmem:[%s2046_s11 + $0x20] sm:$0xff] }
 0x684   : > { %v1217_v63 = vpop.f32.mrf.mxu3 }
 0x685   : > { %v1218_v1 = vadd.f32 %v1217_v63, %v1190_v60  ;;  %v1785_v60 = vld [vmem:[%s2046_s11 + $0x28] sm:$0xff] }
 0x686   : > { %1453 = vmatpush.bf16.msra.mxu1 %v1785_v60 }
 0x687   : > { %v2295_v2 = vadd.f32 %v1218_v1, %v2143_v45 }
 0x689   : > { %v1225_v3 = vsel %vm515_vm7, %v2295_v2, 0.0 }
 0x68a   : > { %1226 = vadd.xlane.f32.xlu1 %v1225_v3  ;;  %1454 = vmatpush.bf16.msra.mxu1 %v1784_v41 }
 0x6f5   : > { %v1224_v4 = vpop.xlane.xlu0 %1223 }
 0x6f6   : > { %v1228_v5 = vmul.f32 %v1224_v4, %v2147_v53 }
 0x6f8   : > { %v1230_v43 = vsub.f32 %v2290_v62, %v1228_v5  ;;  %v1783_v5 = vld [vmem:[%s2046_s11 + $0x18] sm:$0xff] }
 0x6f9   : > { %1455 = vmatpush.bf16.msra.mxu1 %v1783_v5 }
 0x6fa   : > { %v1232_v6 = vmul.f32 %v1230_v43, %v1230_v43 }
 0x6fc   : > { %v1234_v59 = vsel %vm511_vm6, %v1232_v6, 0.0 }
 0x6fd   : > { %v1227_v7 = vpop.xlane.xlu1 %1226  ;;  %1235 = vadd.xlane.f32.xlu2 %v1234_v59 }
 0x6fe   : > { %v1229_v8 = vmul.f32 %v1227_v7, %v2147_v53 }
 0x700   : > { %v1231_v45 = vsub.f32 %v2295_v2, %v1229_v8  ;;  %v1782_v8 = vld [vmem:[%s2046_s11 + $0x10] sm:$0xff] }
 0x701   : > { %1456 = vmatpush.bf16.msra.mxu1 %v1782_v8 }
 0x702   : > { %v1233_v9 = vmul.f32 %v1231_v45, %v1231_v45 }
 0x704   : > { %v1237_v35 = vsel %vm515_vm7, %v1233_v9, 0.0 }
 0x705   : > { %1238 = vadd.xlane.f32.xlu0 %v1237_v35 }
 0x770   : > { %v1236_v10 = vpop.xlane.xlu2 %1235 }
 0x771   : > { %v1240_v11 = vmul.f32 %v1236_v10, %v2147_v53 }
 0x773   : > { %v1242_v12 = vadd.f32 1e-12, %v1240_v11 }
 0x775   : > { %1867 = vrsqrt.f32 %v1242_v12  ;;  %vm1250_vm11 = vweird.f32 %v1242_v12 }
 0x778   : > { %v1239_v14 = vpop.xlane.xlu0 %1238 }
 0x779   : > { %v1241_v15 = vmul.f32 %v1239_v14, %v2147_v53 }
 0x77b   : > { %v1868_v16 = vpop.eup %1867  ;;  %v1243_v17 = vadd.f32 1e-12, %v1241_v15 }
 0x77c   : > { %v1245_v18 = vmul.f32 %v1868_v16, %v1242_v12  ;;  %vm1251_vm10 = vweird.f32 %v1868_v16  ;;  %v1781_v12 = vld [vmem:[%s2046_s11 + $0x8] sm:$0xff] }
 0x77d   : > { %1869 = vrsqrt.f32 %v1243_v17  ;;  %vm1252_vm12 = vmor %vm1250_vm11, %vm1251_vm10  ;;  %vm1260_vm14 = vweird.f32 %v1243_v17  ;;  %1457 = vmatpush.bf16.msra.mxu1 %v1781_v12 }
 0x77e   : > { %v1246_v19 = vmul.f32 %v1868_v16, %v1245_v18 }
 0x780   : > { %v1247_v21 = vmul.f32 0.5, %v1246_v19 }
 0x782   : > { %v1248_v22 = vsub.f32 1.5, %v1247_v21  ;;  %v1780_v21 = vld [vmem:[%s2046_s11] sm:$0xff] }
 0x783   : > { %v1870_v23 = vpop.eup %1869  ;;  %1458 = vmatpush.bf16.msra.mxu1 %v1780_v21 }
 0x784   : > { %v1249_v24 = vmul.f32 %v1868_v16, %v1248_v22  ;;  %v1255_v25 = vmul.f32 %v1870_v23, %v1243_v17  ;;  %vm1261_vm13 = vweird.f32 %v1870_v23 }
 0x785   : > { %vm1262_vm15 = vmor %vm1260_vm14, %vm1261_vm13 }
 0x786   : > { %v1256_v26 = vmul.f32 %v1870_v23, %v1255_v25  ;;  %v1253_v27 = vsel %vm1252_vm12, %v1868_v16, %v1249_v24 }
 0x787   : > { %v1264_v31 = vmul.f32 %v1253_v27, %v1230_v43 }
 0x788   : > { %v1257_v28 = vmul.f32 0.5, %v1256_v26 }
 0x789   : > { %v1267_v36 = vmul.f32 %v1266_v30, %v1264_v31 }
 0x78a   : > { %v1258_v29 = vsub.f32 1.5, %v1257_v28 }
 0x78b   : > { %v1270_v39 = vadd.f32 %v1269_v34, %v1267_v36 }
 0x78c   : > { %v1259_v32 = vmul.f32 %v1870_v23, %v1258_v29 }
 0x78e   : > { %v1263_v33 = vsel %vm1262_vm15, %v1870_v23, %v1259_v32 }
 0x78f   : > { %v1265_v37 = vmul.f32 %v1263_v33, %v1231_v45 }
 0x791   : > { %v1268_v38 = vmul.f32 %v1266_v30, %v1265_v37 }
 0x793   : > { %v1271_v42 = vadd.f32 %v1269_v34, %v1268_v38 }
 0x795   : > { %v1272_v48 = vpack.c.bf16 %v1271_v42, %v1270_v39 }
 0x797   : > { %1732 = vmatmul.msk.bf16.vlgmr.msrb.gmra.mxu0 %vm511_vm6, %v1272_v48 }
 0x814   : > { %v1302_v51 = vpop.f32.mrf.mxu0 }
 0x815   : > { %v2313_v44 = vadd.f32 %v1302_v51, %v1277_v50 }
 0x817   : > { %v2316_v52 = vmul.f32 0.70710677, %v2313_v44 }
 0x819   : > { %v1315_v46 = vand.u32 2147483647, %v2316_v52  ;;  %vm1311_vm10 = vcmp.ge.f32.partialorder %v2316_v52, 0.0 }
 0x81b   : > { %v1317_v55 = vmul.f32 0.3275911, %v1315_v46  ;;  %v1367_v14 = vsub.f32 0.0, %v1315_v46 }
 0x81c   : > { %v1304_v57 = vpop.f32.mrf.mxu0 }
 0x81d   : > { %v1319_v49 = vadd.f32 1.0, %v1317_v55  ;;  %v2321_v58 = vadd.f32 %v1304_v57, %v1277_v50  ;;  %v1369_v23 = vmul.f32 %v1367_v14, %v1315_v46 }
 0x81f   : > { %1871 = vrcp.f32 %v1319_v49  ;;  %v2325_v47 = vmul.f32 0.70710677, %v2321_v58  ;;  %v1332_v6 = vand.u32 2147483648, %v1319_v49  ;;  %v1330_v7 = vand.u32 2147483647, %v1319_v49 }
 0x820   : > { %vm1326_vm1 = vweird.f32 %v1319_v49  ;;  %v1371_v29 = vmul.f32 1.442695, %v1369_v23 }
 0x821   : > { %v1316_v61 = vand.u32 2147483647, %v2325_v47  ;;  %v1333_v9 = vor.u32 1.1754944e-38, %v1332_v6  ;;  %vm1331_vm3 = vcmp.eq.f32.partialorder %v1330_v7, 8.507059e+37  ;;  %vm1312_vm11 = vcmp.ge.f32.partialorder %v2325_v47, 0.0 }
 0x822   : > { %v1308_v7 = vmul.f32 0.5, %v2321_v58 }
 0x823   : > { %v1318_v63 = vmul.f32 0.3275911, %v1316_v61  ;;  %v1368_v31 = vsub.f32 0.0, %v1316_v61 }
 0x825   : > { %v1872_v1 = vpop.eup %1871  ;;  %v1320_v4 = vadd.f32 1.0, %v1318_v63  ;;  %v1370_v37 = vmul.f32 %v1368_v31, %v1316_v61  ;;  %v1948_v63 = vmov -1.0  }
 0x826   : > { %v1322_v3 = vmul.f32 %v1872_v1, %v1319_v49  ;;  %vm1327_vm0 = vweird.f32 %v1872_v1  ;;  %v1314_v5 = vsel %vm1312_vm11, 1.0, %v1948_v63 }
 0x827   : > { %1873 = vrcp.f32 %v1320_v4  ;;  %vm1328_vm2 = vmor %vm1326_vm1, %vm1327_vm0  ;;  %v1346_v17 = vand.u32 2147483648, %v1320_v4  ;;  %v1344_v19 = vand.u32 2147483647, %v1320_v4  ;;  %vm1340_vm5 = vweird.f32 %v1320_v4 }
 0x828   : > { %v1323_v43 = vsub.f32 1.0, %v1322_v3  ;;  %1875 = vpow2.f32 %v1371_v29  ;;  %v1373_v50 = vmul.f32 1.442695, %v1370_v37 }
 0x829   : > { %v1347_v26 = vor.u32 1.1754944e-38, %v1346_v17  ;;  %vm1345_vm9 = vcmp.eq.f32.partialorder %v1344_v19, 8.507059e+37 }
 0x82a   : > { %v1324_v59 = vmul.f32 %v1872_v1, %v1323_v43  ;;  %1877 = vpow2.f32 %v1373_v50 }
 0x82c   : > { %v1325_v45 = vadd.f32 %v1872_v1, %v1324_v59  ;;  %v1307_v59 = vmul.f32 0.5, %v2313_v44 }
 0x82d   : > { %v1874_v35 = vpop.eup %1873 }
 0x82e   : > { %v1329_v10 = vsel %vm1328_vm2, %v1872_v1, %v1325_v45  ;;  %v1336_v11 = vmul.f32 %v1874_v35, %v1320_v4  ;;  %vm1341_vm4 = vweird.f32 %v1874_v35  ;;  %v1876_v54 = vpop.eup %1875  ;;  %v1313_v1 = vsel %vm1311_vm10, 1.0, %v1948_v63 }
 0x82f   : > { %v1334_v40 = vsel %vm1331_vm3, %v1333_v9, %v1329_v10  ;;  %vm1342_vm8 = vmor %vm1340_vm5, %vm1341_vm4 }
 0x830   : > { %v1349_v13 = vmul.f32 1.0614054, %v1334_v40  ;;  %v1337_v15 = vsub.f32 1.0, %v1336_v11  ;;  %v1878_v41 = vpop.eup %1877 }
 0x832   : > { %v1351_v16 = vadd.f32 -1.4531521, %v1349_v13  ;;  %v1338_v18 = vmul.f32 %v1874_v35, %v1337_v15 }
 0x834   : > { %v1353_v22 = vmul.f32 %v1351_v16, %v1334_v40  ;;  %v1339_v24 = vadd.f32 %v1874_v35, %v1338_v18 }
 0x836   : > { %v1355_v25 = vadd.f32 1.4214138, %v1353_v22  ;;  %v1343_v27 = vsel %vm1342_vm8, %v1874_v35, %v1339_v24  ;;  %v1402_v35 = vperm.slane %v2160_v20, 7 }
 0x837   : > { %v1348_v30 = vsel %vm1345_vm9, %v1347_v26, %v1343_v27 }
 0x838   : > { %v1357_v28 = vmul.f32 %v1355_v25, %v1334_v40  ;;  %v1350_v32 = vmul.f32 1.0614054, %v1348_v30 }
 0x83a   : > { %v1359_v33 = vadd.f32 -0.28449672, %v1357_v28  ;;  %v1352_v34 = vadd.f32 -1.4531521, %v1350_v32 }
 0x83c   : > { %v1361_v36 = vmul.f32 %v1359_v33, %v1334_v40  ;;  %v1354_v38 = vmul.f32 %v1352_v34, %v1348_v30 }
 0x83e   : > { %v1363_v39 = vadd.f32 0.2548296, %v1361_v36  ;;  %v1356_v42 = vadd.f32 1.4214138, %v1354_v38 }
 0x840   : > { %v1365_v48 = vmul.f32 %v1363_v39, %v1334_v40  ;;  %v1358_v51 = vmul.f32 %v1356_v42, %v1348_v30 }
 0x842   : > { %v1375_v46 = vmul.f32 %v1876_v54, %v1365_v48  ;;  %v1360_v55 = vadd.f32 -0.28449672, %v1358_v51 }
 0x844   : > { %v1362_v56 = vmul.f32 %v1360_v55, %v1348_v30  ;;  %v1377_v57 = vsub.f32 1.0, %v1375_v46 }
 0x846   : > { %v1364_v49 = vadd.f32 0.2548296, %v1362_v56  ;;  %v1379_v61 = vmul.f32 %v1377_v57, %v1313_v1 }
 0x848   : > { %v1366_v60 = vmul.f32 %v1364_v49, %v1348_v30  ;;  %v1381_v43 = vadd.f32 1.0, %v1379_v61 }
 0x84a   : > { %v1376_v3 = vmul.f32 %v1878_v41, %v1366_v60  ;;  %v1383_v52 = vmul.f32 %v1381_v43, %v1307_v59 }
 0x84c   : > { %v1378_v4 = vsub.f32 1.0, %v1376_v3 }
 0x84e   : > { %v1380_v6 = vmul.f32 %v1378_v4, %v1314_v5 }
 0x850   : > { %v1382_v8 = vadd.f32 1.0, %v1380_v6 }
 0x852   : > { %v1384_v45 = vmul.f32 %v1382_v8, %v1308_v7 }
 0x854   : > { %v1385_v9 = vpack.c.bf16 %v1384_v45, %v1383_v52 }
 0x856   : > { %1459 = vmatmul.bf16.vlgmr.msra.gmra.mxu1 %v1385_v9 }
 0x8d3   : > { %v1460_v10 = vpop.f32.mrf.mxu1 }
 0x8d4   : > { %v1461_v40 = vadd.f32 %v1460_v10, %v1402_v35 }
 0x8d6   : > { %v1465_v47 = vadd.f32 %v1461_v40, %v2290_v62 }
 0x8d8   : > { %1467 = vst.msk [vmem:[#allocation2] sm:$0xff] %vm511_vm6, %v1465_v47 }
 0x8db   : > { %v1462_v11 = vpop.f32.mrf.mxu1 }
 0x8dc   : > { %v1463_v12 = vadd.f32 %v1462_v11, %v1402_v35  ;;  %1472 = sbr.rel (%p1765_p6) target bundleno = 2551 (0x9f7), region = 60 }
 0x8de   : > { %v1466_v13 = vadd.f32 %v1463_v12, %v2295_v2 }
 0x8e0   : > { %1468 = vst.msk [vmem:[#allocation2 + $0x8] sm:$0x3] %vm515_vm7, %v1466_v13 }
 0x8e1   : > { %vm1473_vm12 = vcmask 253952   ;;  %vm1504_vm13 = vcmask 259077   ;;  %v1497_v37 = vrot.slane %v2020_v0, 2  ;;  %v1500_v42 = vrot.slane %v2020_v0, 3 }
 0x8e2   : > { %v1474_v44 = vsel %vm1473_vm12, %v1465_v47, 0.0  ;;  %v1505_v20 = vsel %vm1504_vm13, %v1465_v47, 0.0  ;;  %v1527_v55 = vrot.slane %v2020_v0, 5  ;;  %v1530_v57 = vrot.slane %v2020_v0, 6 }
 0x8e3   : > { %1475 = vadd.xlane.f32.xlu0 %v1474_v44 }
 0x8eb   : > { %1506 = vadd.xlane.f32.xlu0 %v1505_v20 }
 0x956   : > { %v1476_v62 = vpop.xlane.xlu0 %1475 }
 0x957   : > { %v1477_v58 = vmul.f32 %v1476_v62, %v2147_v53 }
 0x959   : > { %v1478_v14 = vsub.f32 %v1465_v47, %v1477_v58 }
 0x95b   : > { %v1479_v15 = vmul.f32 %v1478_v14, %v1478_v14 }
 0x95d   : > { %v1480_v2 = vsel %vm1473_vm12, %v1479_v15, 0.0 }
 0x95e   : > { %1481 = vadd.xlane.f32.xlu1 %v1480_v2  ;;  %v1507_v16 = vpop.xlane.xlu0 %1506 }
 0x95f   : > { %v1508_v17 = vmul.f32 %v1507_v16, %v2147_v53 }
 0x961   : > { %v1509_v18 = vsub.f32 %v1465_v47, %v1508_v17 }
 0x963   : > { %v1510_v19 = vmul.f32 %v1509_v18, %v1509_v18 }
 0x965   : > { %v1511_v21 = vsel %vm1504_vm13, %v1510_v19, 0.0 }
 0x966   : > { %1512 = vadd.xlane.f32.xlu1 %v1511_v21 }
 0x9d1   : > { %v1482_v22 = vpop.xlane.xlu1 %1481 }
 0x9d2   : > { %v1483_v23 = vmul.f32 %v1482_v22, %v2147_v53 }
 0x9d4   : > { %v1484_v24 = vadd.f32 1e-12, %v1483_v23 }
 0x9d6   : > { %1879 = vrsqrt.f32 %v1484_v24  ;;  %vm1491_vm7 = vweird.f32 %v1484_v24 }
 0x9d9   : > { %v1513_v25 = vpop.xlane.xlu1 %1512 }
 0x9da   : > { %v1514_v26 = vmul.f32 %v1513_v25, %v2147_v53 }
 0x9dc   : > { %v1880_v27 = vpop.eup %1879  ;;  %v1515_v28 = vadd.f32 1e-12, %v1514_v26 }
 0x9dd   : > { %v1486_v29 = vmul.f32 %v1880_v27, %v1484_v24  ;;  %vm1492_vm6 = vweird.f32 %v1880_v27 }
 0x9de   : > { %1881 = vrsqrt.f32 %v1515_v28  ;;  %vm1493_vm14 = vmor %vm1491_vm7, %vm1492_vm6  ;;  %vm1522_vm0 = vweird.f32 %v1515_v28 }
 0x9df   : > { %v1487_v30 = vmul.f32 %v1880_v27, %v1486_v29 }
 0x9e1   : > { %v1488_v31 = vmul.f32 0.5, %v1487_v30 }
 0x9e3   : > { %v1489_v32 = vsub.f32 1.5, %v1488_v31 }
 0x9e4   : > { %v1882_v33 = vpop.eup %1881 }
 0x9e5   : > { %v1490_v34 = vmul.f32 %v1880_v27, %v1489_v32  ;;  %v1517_v36 = vmul.f32 %v1882_v33, %v1515_v28  ;;  %vm1523_vm15 = vweird.f32 %v1882_v33 }
 0x9e6   : > { %vm1524_vm1 = vmor %vm1522_vm0, %vm1523_vm15 }
 0x9e7   : > { %v1494_v38 = vsel %vm1493_vm14, %v1880_v27, %v1490_v34  ;;  %v1518_v39 = vmul.f32 %v1882_v33, %v1517_v36 }
 0x9e8   : > { %v1495_v53 = vmul.f32 %v1494_v38, %v1478_v14 }
 0x9e9   : > { %v1519_v48 = vmul.f32 0.5, %v1518_v39 }
 0x9ea   : > { %v1499_v50 = vmul.f32 %v1497_v37, %v1495_v53 }
 0x9eb   : > { %v1520_v51 = vsub.f32 1.5, %v1519_v48 }
 0x9ec   : > { %v1502_v54 = vadd.f32 %v1500_v42, %v1499_v50 }
 0x9ed   : > { %v1521_v46 = vmul.f32 %v1882_v33, %v1520_v51 }
 0x9ee   : > { %1503 = vst.msk [vmem:[#allocation4] sm:$0x1] %vm1473_vm12, %v1502_v54 }
 0x9ef   : > { %v1525_v56 = vsel %vm1524_vm1, %v1882_v33, %v1521_v46 }
 0x9f0   : > { %v1526_v49 = vmul.f32 %v1525_v56, %v1509_v18 }
 0x9f2   : > { %v1529_v60 = vmul.f32 %v1527_v55, %v1526_v49 }
 0x9f4   : > { %v1532_v41 = vadd.f32 %v1530_v57, %v1529_v60 }
 0x9f6   : > { %1533 = vst.msk [vmem:[#allocation4 - $0x4] sm:$0x20] %vm1504_vm13, %v1532_v41 }
 0x9f7 PF: > { %p1792_p7 = scmp.eq.s32.totalorder %s1658_s30, 1  ;;  %s1544_s25 = sshll.u32 %s2379_s8, 4  ;;  %s1545_s25 = int_to_ptr.hbm [resolvable:$true] %s1544_s25 }
 0x9f8   : > { %s1949_s11 = smov [#allocation4]  }
 0x9f9   : > { %s1542_s13 = sshll.u32 %s1949_s11, 4  ;;  %s1543_s13 = int_to_ptr.vmem [resolvable:$true] %s1542_s13 }
 0x9fa   : > { %1789 = dma.vmem_to_hbm [thread:$0]  (%p1792_p7), %s1543_s13, 32, %s1545_s25, [#allocation5]  }
 0x9fb   : > { %1924 = dma.done.wait (%p1792_p7), [#allocation5], 32  }
 0x9fc   : > { %1926 = vsyncadd (%p1792_p7), [#allocation5], 4294967264 }
 0x9fd PF: > { %s19_s29 = sadd.s32 1, %s1937_s29   ;;  %s2380_s27 = smov %s1933_s28 }
 0x9fe   : > { %p16_p8 = scmp.ge.s32.totalorder %s19_s29, 4   ;;  %s2381_s28 = smov %s2383_s9 }
 0xa00   :  { %18 = sbr.rel (!%p16_p8) target bundleno = 2 (0x2), region = 103 }
 0xa05   :  { %1558 = vsyncpa [#allocation5], 1 }
 0xa06   :  { %1560 = vsyncpa [#allocation5 + $0x1], 1 }

</bundles_post_ra>
